<compile_context>
chip_gen: v7x
topology: tpu7x:2x2x1
jax: 0.10.0
libtpu: 0.0.40
codegen_flags: <defaults>
</compile_context>

<pallas_src>
import functools

import jax
import jax.numpy as jnp
from jax import lax
from jax.experimental import pallas as pl
from jax.experimental.pallas import tpu as pltpu

GP = 128   # gate pitch: each GRU gate / head lives in its own 128-lane block
HP = 128   # hidden rows padded to a full lane tile (requires H <= 128)
KP = 16    # input-projection contraction rows, bf16-sublane aligned (>= O + I + 1)


def _grusde_kernel(xn_ref, w_ref, misc_ref, out_ref, *, B, Bp, T, I, O):
    f32 = jnp.float32
    bf16 = jnp.bfloat16

    # ---- unpack the bf16 weight slab (all slices 16-sublane / 128-lane aligned) ----
    wixt  = w_ref[0:KP, :]                  # (KP, 3GP) [noise rows=0 | x rows=wi | mask row=0]
    wh    = w_ref[KP:KP + HP, :]            # (HP, 3GP) hidden -> [r|z|n]
    whead = w_ref[KP + HP:KP + 2 * HP, :]   # (HP, 3GP) [mu | sigma | nl replicated over O]

    # ---- unpack the small f32 misc slab ----
    bias_x = misc_ref[0:1, :]               # (1, 3GP)  [b_ir+b_hr | b_iz+b_hz | b_in]
    bhead  = misc_ref[1:2, :]               # (1, 3GP)
    gamma  = misc_ref[2:3, 0:GP]            # (1, GP)
    beta   = misc_ref[2:3, GP:2 * GP]       # (1, GP)
    bhn    = misc_ref[8:8 + Bp, 0:GP]       # (Bp, GP)  b_hn pre-broadcast over sublanes

    xn = xn_ref[...]                        # (T*Bp, KP) f32, lanes = [noise | x | valid | 0]

    # ---- hoisted input projection for ALL timesteps: one MXU dot ----
    xg = jnp.dot(xn.astype(bf16), wixt, preferred_element_type=f32) + bias_x   # (T*Bp, 3GP)

    # ---- serial GRU recurrence, fully unrolled; gate math stays f32 (v5e-safe) ----
    h = jnp.zeros((Bp, GP), f32)
    hs = []
    for t in range(T):
        xg_t = xg[t * Bp:(t + 1) * Bp, :]                          # sublane-aligned slice
        hg = jnp.dot(h.astype(bf16), wh, preferred_element_type=f32)   # (Bp, 3GP)
        rz = jax.nn.sigmoid(xg_t[:, :2 * GP] + hg[:, :2 * GP])     # r|z, whole-vreg slices
        r = rz[:, :GP]
        z = rz[:, GP:]
        # PyTorch: n = tanh(W_in x + b_in + r*(W_hn h + b_hn)) — b_hn stays inside r*(...)
        n = jnp.tanh(xg_t[:, 2 * GP:] + r * (hg[:, 2 * GP:] + bhn))
        h = n + z * (h - n)                                        # == (1-z)*n + z*h
        hs.append(h)

    g = jnp.concatenate(hs, axis=0)                                # (T*Bp, GP), row = t*Bp + b

    # ---- BatchNorm1d over the valid (B,T) rows, per hidden channel (single pass) ----
    mask = xn[:, O + I:O + I + 1]                                  # 1.0 on real batch rows
    inv_n = 1.0 / float(T * B)
    gm = g * mask
    mean = jnp.sum(gm, axis=0, keepdims=True) * inv_n              # (1, GP)
    ex2 = jnp.sum(gm * g, axis=0, keepdims=True) * inv_n
    var = ex2 - mean * mean                                        # biased variance (train mode)
    scale = gamma * lax.rsqrt(var + 1e-5)
    shift = beta - mean * scale
    g = g * scale + shift                                          # single-FMA BN epilogue
    # dropout -> identity (inference mode)

    # ---- fused heads: one dot, lane-aligned slices ----
    head = jnp.dot(g.astype(bf16), whead, preferred_element_type=f32) + bhead  # (T*Bp, 3GP)
    mu = head[:, 0:O]
    sigma = jax.nn.softplus(head[:, GP:GP + O])
    nl = jax.nn.sigmoid(head[:, 2 * GP:2 * GP + O])                # already replicated over O

    noise = xn[:, 0:O]
    # dt = 1.0  =>  sde = mu*dt + sigma * (nl * eps) * sqrt(dt)
    out_ref[...] = mu + sigma * (nl * noise)


def grusde_forward(x, params, noise):
    B, T, I = x.shape
    H = params["w_hr"].shape[0]
    O = params["w_mu"].shape[1]
    assert H <= GP and O <= GP and (O + I + 1) <= KP

    Bp = ((B + 7) // 8) * 8          # pad batch to the f32 sublane tile
    f32 = jnp.float32

    def pad_lanes(w):                # (rows, k) -> (rows, GP), zero padded
        return jnp.pad(w, ((0, 0), (0, GP - w.shape[1])))

    # ---- fused, lane-block-padded weights (one-time, outside the kernel) ----
    wi = jnp.concatenate([pad_lanes(params["w_ir"]), pad_lanes(params["w_iz"]),
                          pad_lanes(params["w_in"])], axis=1)                     # (I, 3GP)
    wh = jnp.concatenate([pad_lanes(params["w_hr"]), pad_lanes(params["w_hz"]),
                          pad_lanes(params["w_hn"])], axis=1)                     # (H, 3GP)
    whead = jnp.concatenate([pad_lanes(params["w_mu"]), pad_lanes(params["w_sigma"]),
                             pad_lanes(jnp.tile(params["w_nl"], (1, O)))], axis=1)  # (H, 3GP)

    wixt = jnp.zeros((KP, 3 * GP), f32).at[O:O + I, :].set(wi)      # noise/mask rows are zero
    wh_pad = jnp.zeros((HP, 3 * GP), f32).at[:H, :].set(wh)
    whead_pad = jnp.zeros((HP, 3 * GP), f32).at[:H, :].set(whead)
    wslab = jnp.concatenate([wixt, wh_pad, whead_pad], axis=0).astype(jnp.bfloat16)

    # ---- small f32 misc slab: biases, gamma/beta, pre-broadcast b_hn ----
    bias_x = jnp.concatenate([pad_lanes(params["b_ir"] + params["b_hr"]),
                              pad_lanes(params["b_iz"] + params["b_hz"]),
                              pad_lanes(params["b_in"])], axis=1)                 # (1, 3GP)
    bhead = jnp.concatenate([pad_lanes(params["b_mu"]), pad_lanes(params["b_sigma"]),
                             pad_lanes(jnp.tile(params["b_nl"], (1, O)))], axis=1)
    gb_row = jnp.concatenate([pad_lanes(params["bn_gamma"]), pad_lanes(params["bn_beta"]),
                              jnp.zeros((1, GP), f32)], axis=1)
    misc = jnp.zeros((8 + Bp, 3 * GP), f32)
    misc = misc.at[0:1].set(bias_x).at[1:2].set(bhead).at[2:3].set(gb_row)
    misc = misc.at[8:8 + Bp, 0:GP].set(jnp.tile(pad_lanes(params["b_hn"]), (Bp, 1)))

    # ---- input slab: time-major, batch padded to Bp, lanes = [noise | x | valid | 0] ----
    xp = jnp.zeros((T, Bp, I), f32).at[:, :B, :].set(jnp.transpose(x, (1, 0, 2)))
    npad = jnp.zeros((T, Bp, O), f32).at[:, :B, :].set(jnp.transpose(noise, (1, 0, 2)))
    valid = jnp.zeros((T, Bp, 1), f32).at[:, :B, :].set(1.0)
    xn = jnp.concatenate(
        [npad, xp, valid, jnp.zeros((T, Bp, KP - (O + I + 1)), f32)], axis=-1
    ).reshape(T * Bp, KP)

    vmem = pl.BlockSpec(memory_space=pltpu.MemorySpace.VMEM)
    kernel = functools.partial(_grusde_kernel, B=B, Bp=Bp, T=T, I=I, O=O)

    cost = pl.CostEstimate(
        flops=2 * T * Bp * 3 * GP * (KP + 2 * HP),
        transcendentals=T * Bp * 3 * GP + 4 * T * Bp * O,
        bytes_accessed=xn.size * 4 + wslab.size * 2 + misc.size * 4 + T * Bp * O * 4,
    )

    out2 = pl.pallas_call(
        kernel,
        out_shape=jax.ShapeDtypeStruct((T * Bp, O), f32),
        in_specs=[vmem, vmem, vmem],
        out_specs=vmem,
        compiler_params=pltpu.CompilerParams(vmem_limit_bytes=4 * 1024 * 1024),
        cost_estimate=cost,
    )(xn, wslab, misc)

    # Back to PyTorch batch-first layout (B, T, O), dropping batch padding rows.
    return jnp.transpose(out2.reshape(T, Bp, O)[:, :B, :], (1, 0, 2))
    # TODO(synk): if B grows, add a "parallel" grid axis over batch (two-pass BN) so
    # v7x's second TensorCore is used; at B=2,T=8 a single grid point is the right call.


def init_params(key, input_size, hidden_size, output_size):
    """Deterministic synthetic parameters, PyTorch-style uniform(-1/sqrt(H), 1/sqrt(H))."""
    I, H, O = input_size, hidden_size, output_size
    s = 1.0 / float(H) ** 0.5
    keys = iter(jax.random.split(key, 24))

    def u(shape):
        return jax.random.uniform(next(keys), shape, jnp.float32, -s, s)

    return {
        # GRU input-to-hidden (stored transposed: (I, H)) and hidden-to-hidden ((H, H))
        "w_ir": u((I, H)), "w_iz": u((I, H)), "w_in": u((I, H)),
        "w_hr": u((H, H)), "w_hz": u((H, H)), "w_hn": u((H, H)),
        "b_ir": u((1, H)), "b_iz": u((1, H)), "b_in": u((1, H)),
        "b_hr": u((1, H)), "b_hz": u((1, H)), "b_hn": u((1, H)),
        # BatchNorm1d affine
        "bn_gamma": jnp.ones((1, H), jnp.float32),
        "bn_beta": jnp.zeros((1, H), jnp.float32),
        # Linear heads (stored transposed: (H, out))
        "w_mu": u((H, O)), "b_mu": u((1, O)),
        "w_sigma": u((H, O)), "b_sigma": u((1, O)),
        "w_nl": u((H, 1)), "b_nl": u((1, 1)),
    }


if __name__ == "__main__":
    B, T = 2, 8
    INPUT_SIZE = 4
    HIDDEN_SIZE = 32
    OUTPUT_SIZE = 4

    root = jax.random.PRNGKey(0)
    k_param, k_x, k_noise = jax.random.split(root, 3)

    params = init_params(k_param, INPUT_SIZE, HIDDEN_SIZE, OUTPUT_SIZE)
    x = jax.random.normal(k_x, (B, T, INPUT_SIZE), jnp.float32)
    noise = jax.random.normal(k_noise, (B, T, OUTPUT_SIZE), jnp.float32)  # torch.randn_like(sigma)

    out = jax.jit(grusde_forward)(x, params, noise)
    out = jax.block_until_ready(out)
    assert out.shape == (B, T, OUTPUT_SIZE)
    assert bool(jnp.all(jnp.isfinite(out)))
    print("KERNEL_OK")
</pallas_src>

<mosaic_0001>
module attributes {stable_mosaic.version = 11 : i64} {
  func.func @_grusde_kernel(%arg0: memref<64x16xf32, #tpu.memory_space<vmem>>, %arg1: memref<272x384xbf16, #tpu.memory_space<vmem>>, %arg2: memref<16x384xf32, #tpu.memory_space<vmem>>, %arg3: memref<64x4xf32, #tpu.memory_space<vmem>>) attributes {dimension_semantics = [], scalar_prefetch = 0 : i64, scratch_operands = 0 : i64, tpu.core_type = #tpu.core_type<tc>} {
    %c0 = arith.constant 0 : index
    %c0_0 = arith.constant 0 : index
    %0 = vector.load %arg1[%c0, %c0_0] : memref<272x384xbf16, #tpu.memory_space<vmem>>, vector<16x384xbf16>
    %c16 = arith.constant 16 : index
    %c0_1 = arith.constant 0 : index
    %1 = vector.load %arg1[%c16, %c0_1] : memref<272x384xbf16, #tpu.memory_space<vmem>>, vector<128x384xbf16>
    %c144 = arith.constant 144 : index
    %c0_2 = arith.constant 0 : index
    %2 = vector.load %arg1[%c144, %c0_2] : memref<272x384xbf16, #tpu.memory_space<vmem>>, vector<128x384xbf16>
    %c0_3 = arith.constant 0 : index
    %c0_4 = arith.constant 0 : index
    %3 = vector.load %arg2[%c0_3, %c0_4] : memref<16x384xf32, #tpu.memory_space<vmem>>, vector<1x384xf32>
    %c1 = arith.constant 1 : index
    %c0_5 = arith.constant 0 : index
    %4 = vector.load %arg2[%c1, %c0_5] : memref<16x384xf32, #tpu.memory_space<vmem>>, vector<1x384xf32>
    %c2 = arith.constant 2 : index
    %c0_6 = arith.constant 0 : index
    %5 = vector.load %arg2[%c2, %c0_6] : memref<16x384xf32, #tpu.memory_space<vmem>>, vector<1x128xf32>
    %c2_7 = arith.constant 2 : index
    %c128 = arith.constant 128 : index
    %6 = vector.load %arg2[%c2_7, %c128] : memref<16x384xf32, #tpu.memory_space<vmem>>, vector<1x128xf32>
    %c8 = arith.constant 8 : index
    %c0_8 = arith.constant 0 : index
    %7 = vector.load %arg2[%c8, %c0_8] : memref<16x384xf32, #tpu.memory_space<vmem>>, vector<8x128xf32>
    %c0_9 = arith.constant 0 : index
    %c0_10 = arith.constant 0 : index
    %8 = vector.load %arg0[%c0_9, %c0_10] : memref<64x16xf32, #tpu.memory_space<vmem>>, vector<64x16xf32>
    %9 = arith.truncf %8 : vector<64x16xf32> to vector<64x16xbf16>
    %cst = arith.constant dense<0.000000e+00> : vector<64x384xf32>
    %10 = tpu.matmul %9, %0, %cst {dimension_numbers = #tpu.dot_dimension_numbers<[1], [0], [0], [1], [0, 0, 1, 1], [], []>} : vector<64x16xbf16>, vector<16x384xbf16>, vector<64x384xf32> -> vector<64x384xf32>
    %11 = vector.broadcast %3 : vector<1x384xf32> to vector<64x384xf32>
    %12 = arith.addf %10, %11 : vector<64x384xf32>
    %cst_11 = arith.constant 0.000000e+00 : f32
    %13 = vector.broadcast %cst_11 : f32 to vector<8x128xf32>
    %14 = vector.extract_strided_slice %12 {offsets = [0, 0], sizes = [8, 384], strides = [1, 1]} : vector<64x384xf32> to vector<8x384xf32>
    %15 = arith.truncf %13 : vector<8x128xf32> to vector<8x128xbf16>
    %cst_12 = arith.constant dense<0.000000e+00> : vector<8x384xf32>
    %16 = tpu.matmul %15, %1, %cst_12 {dimension_numbers = #tpu.dot_dimension_numbers<[1], [0], [0], [1], [0, 0, 1, 1], [], []>} : vector<8x128xbf16>, vector<128x384xbf16>, vector<8x384xf32> -> vector<8x384xf32>
    %17 = vector.extract_strided_slice %14 {offsets = [0, 0], sizes = [8, 256], strides = [1, 1]} : vector<8x384xf32> to vector<8x256xf32>
    %18 = vector.extract_strided_slice %16 {offsets = [0, 0], sizes = [8, 256], strides = [1, 1]} : vector<8x384xf32> to vector<8x256xf32>
    %19 = arith.addf %17, %18 : vector<8x256xf32>
    %20 = arith.negf %19 : vector<8x256xf32>
    %21 = math.exp %20 : vector<8x256xf32>
    %cst_13 = arith.constant 1.000000e+00 : f32
    %22 = vector.broadcast %cst_13 : f32 to vector<8x256xf32>
    %23 = arith.addf %22, %21 : vector<8x256xf32>
    %24 = arith.divf %22, %23 : vector<8x256xf32>
    %25 = vector.extract_strided_slice %24 {offsets = [0, 0], sizes = [8, 128], strides = [1, 1]} : vector<8x256xf32> to vector<8x128xf32>
    %26 = vector.extract_strided_slice %24 {offsets = [0, 128], sizes = [8, 128], strides = [1, 1]} : vector<8x256xf32> to vector<8x128xf32>
    %27 = vector.extract_strided_slice %14 {offsets = [0, 256], sizes = [8, 128], strides = [1, 1]} : vector<8x384xf32> to vector<8x128xf32>
    %28 = vector.extract_strided_slice %16 {offsets = [0, 256], sizes = [8, 128], strides = [1, 1]} : vector<8x384xf32> to vector<8x128xf32>
    %29 = arith.addf %28, %7 : vector<8x128xf32>
    %30 = arith.mulf %25, %29 : vector<8x128xf32>
    %31 = arith.addf %27, %30 : vector<8x128xf32>
    %32 = math.tanh %31 : vector<8x128xf32>
    %33 = arith.subf %13, %32 : vector<8x128xf32>
    %34 = arith.mulf %26, %33 : vector<8x128xf32>
    %35 = arith.addf %32, %34 : vector<8x128xf32>
    %36 = vector.extract_strided_slice %12 {offsets = [8, 0], sizes = [8, 384], strides = [1, 1]} : vector<64x384xf32> to vector<8x384xf32>
    %37 = arith.truncf %35 : vector<8x128xf32> to vector<8x128xbf16>
    %cst_14 = arith.constant dense<0.000000e+00> : vector<8x384xf32>
    %38 = tpu.matmul %37, %1, %cst_14 {dimension_numbers = #tpu.dot_dimension_numbers<[1], [0], [0], [1], [0, 0, 1, 1], [], []>} : vector<8x128xbf16>, vector<128x384xbf16>, vector<8x384xf32> -> vector<8x384xf32>
    %39 = vector.extract_strided_slice %36 {offsets = [0, 0], sizes = [8, 256], strides = [1, 1]} : vector<8x384xf32> to vector<8x256xf32>
    %40 = vector.extract_strided_slice %38 {offsets = [0, 0], sizes = [8, 256], strides = [1, 1]} : vector<8x384xf32> to vector<8x256xf32>
    %41 = arith.addf %39, %40 : vector<8x256xf32>
    %42 = arith.negf %41 : vector<8x256xf32>
    %43 = math.exp %42 : vector<8x256xf32>
    %cst_15 = arith.constant 1.000000e+00 : f32
    %44 = vector.broadcast %cst_15 : f32 to vector<8x256xf32>
    %45 = arith.addf %44, %43 : vector<8x256xf32>
    %46 = arith.divf %44, %45 : vector<8x256xf32>
    %47 = vector.extract_strided_slice %46 {offsets = [0, 0], sizes = [8, 128], strides = [1, 1]} : vector<8x256xf32> to vector<8x128xf32>
    %48 = vector.extract_strided_slice %46 {offsets = [0, 128], sizes = [8, 128], strides = [1, 1]} : vector<8x256xf32> to vector<8x128xf32>
    %49 = vector.extract_strided_slice %36 {offsets = [0, 256], sizes = [8, 128], strides = [1, 1]} : vector<8x384xf32> to vector<8x128xf32>
    %50 = vector.extract_strided_slice %38 {offsets = [0, 256], sizes = [8, 128], strides = [1, 1]} : vector<8x384xf32> to vector<8x128xf32>
    %51 = arith.addf %50, %7 : vector<8x128xf32>
    %52 = arith.mulf %47, %51 : vector<8x128xf32>
    %53 = arith.addf %49, %52 : vector<8x128xf32>
    %54 = math.tanh %53 : vector<8x128xf32>
    %55 = arith.subf %35, %54 : vector<8x128xf32>
    %56 = arith.mulf %48, %55 : vector<8x128xf32>
    %57 = arith.addf %54, %56 : vector<8x128xf32>
    %58 = vector.extract_strided_slice %12 {offsets = [16, 0], sizes = [8, 384], strides = [1, 1]} : vector<64x384xf32> to vector<8x384xf32>
    %59 = arith.truncf %57 : vector<8x128xf32> to vector<8x128xbf16>
    %cst_16 = arith.constant dense<0.000000e+00> : vector<8x384xf32>
    %60 = tpu.matmul %59, %1, %cst_16 {dimension_numbers = #tpu.dot_dimension_numbers<[1], [0], [0], [1], [0, 0, 1, 1], [], []>} : vector<8x128xbf16>, vector<128x384xbf16>, vector<8x384xf32> -> vector<8x384xf32>
    %61 = vector.extract_strided_slice %58 {offsets = [0, 0], sizes = [8, 256], strides = [1, 1]} : vector<8x384xf32> to vector<8x256xf32>
    %62 = vector.extract_strided_slice %60 {offsets = [0, 0], sizes = [8, 256], strides = [1, 1]} : vector<8x384xf32> to vector<8x256xf32>
    %63 = arith.addf %61, %62 : vector<8x256xf32>
    %64 = arith.negf %63 : vector<8x256xf32>
    %65 = math.exp %64 : vector<8x256xf32>
    %cst_17 = arith.constant 1.000000e+00 : f32
    %66 = vector.broadcast %cst_17 : f32 to vector<8x256xf32>
    %67 = arith.addf %66, %65 : vector<8x256xf32>
    %68 = arith.divf %66, %67 : vector<8x256xf32>
    %69 = vector.extract_strided_slice %68 {offsets = [0, 0], sizes = [8, 128], strides = [1, 1]} : vector<8x256xf32> to vector<8x128xf32>
    %70 = vector.extract_strided_slice %68 {offsets = [0, 128], sizes = [8, 128], strides = [1, 1]} : vector<8x256xf32> to vector<8x128xf32>
    %71 = vector.extract_strided_slice %58 {offsets = [0, 256], sizes = [8, 128], strides = [1, 1]} : vector<8x384xf32> to vector<8x128xf32>
    %72 = vector.extract_strided_slice %60 {offsets = [0, 256], sizes = [8, 128], strides = [1, 1]} : vector<8x384xf32> to vector<8x128xf32>
    %73 = arith.addf %72, %7 : vector<8x128xf32>
    %74 = arith.mulf %69, %73 : vector<8x128xf32>
    %75 = arith.addf %71, %74 : vector<8x128xf32>
    %76 = math.tanh %75 : vector<8x128xf32>
    %77 = arith.subf %57, %76 : vector<8x128xf32>
    %78 = arith.mulf %70, %77 : vector<8x128xf32>
    %79 = arith.addf %76, %78 : vector<8x128xf32>
    %80 = vector.extract_strided_slice %12 {offsets = [24, 0], sizes = [8, 384], strides = [1, 1]} : vector<64x384xf32> to vector<8x384xf32>
    %81 = arith.truncf %79 : vector<8x128xf32> to vector<8x128xbf16>
    %cst_18 = arith.constant dense<0.000000e+00> : vector<8x384xf32>
    %82 = tpu.matmul %81, %1, %cst_18 {dimension_numbers = #tpu.dot_dimension_numbers<[1], [0], [0], [1], [0, 0, 1, 1], [], []>} : vector<8x128xbf16>, vector<128x384xbf16>, vector<8x384xf32> -> vector<8x384xf32>
    %83 = vector.extract_strided_slice %80 {offsets = [0, 0], sizes = [8, 256], strides = [1, 1]} : vector<8x384xf32> to vector<8x256xf32>
    %84 = vector.extract_strided_slice %82 {offsets = [0, 0], sizes = [8, 256], strides = [1, 1]} : vector<8x384xf32> to vector<8x256xf32>
    %85 = arith.addf %83, %84 : vector<8x256xf32>
    %86 = arith.negf %85 : vector<8x256xf32>
    %87 = math.exp %86 : vector<8x256xf32>
    %cst_19 = arith.constant 1.000000e+00 : f32
    %88 = vector.broadcast %cst_19 : f32 to vector<8x256xf32>
    %89 = arith.addf %88, %87 : vector<8x256xf32>
    %90 = arith.divf %88, %89 : vector<8x256xf32>
    %91 = vector.extract_strided_slice %90 {offsets = [0, 0], sizes = [8, 128], strides = [1, 1]} : vector<8x256xf32> to vector<8x128xf32>
    %92 = vector.extract_strided_slice %90 {offsets = [0, 128], sizes = [8, 128], strides = [1, 1]} : vector<8x256xf32> to vector<8x128xf32>
    %93 = vector.extract_strided_slice %80 {offsets = [0, 256], sizes = [8, 128], strides = [1, 1]} : vector<8x384xf32> to vector<8x128xf32>
    %94 = vector.extract_strided_slice %82 {offsets = [0, 256], sizes = [8, 128], strides = [1, 1]} : vector<8x384xf32> to vector<8x128xf32>
    %95 = arith.addf %94, %7 : vector<8x128xf32>
    %96 = arith.mulf %91, %95 : vector<8x128xf32>
    %97 = arith.addf %93, %96 : vector<8x128xf32>
    %98 = math.tanh %97 : vector<8x128xf32>
    %99 = arith.subf %79, %98 : vector<8x128xf32>
    %100 = arith.mulf %92, %99 : vector<8x128xf32>
    %101 = arith.addf %98, %100 : vector<8x128xf32>
    %102 = vector.extract_strided_slice %12 {offsets = [32, 0], sizes = [8, 384], strides = [1, 1]} : vector<64x384xf32> to vector<8x384xf32>
    %103 = arith.truncf %101 : vector<8x128xf32> to vector<8x128xbf16>
    %cst_20 = arith.constant dense<0.000000e+00> : vector<8x384xf32>
    %104 = tpu.matmul %103, %1, %cst_20 {dimension_numbers = #tpu.dot_dimension_numbers<[1], [0], [0], [1], [0, 0, 1, 1], [], []>} : vector<8x128xbf16>, vector<128x384xbf16>, vector<8x384xf32> -> vector<8x384xf32>
    %105 = vector.extract_strided_slice %102 {offsets = [0, 0], sizes = [8, 256], strides = [1, 1]} : vector<8x384xf32> to vector<8x256xf32>
    %106 = vector.extract_strided_slice %104 {offsets = [0, 0], sizes = [8, 256], strides = [1, 1]} : vector<8x384xf32> to vector<8x256xf32>
    %107 = arith.addf %105, %106 : vector<8x256xf32>
    %108 = arith.negf %107 : vector<8x256xf32>
    %109 = math.exp %108 : vector<8x256xf32>
    %cst_21 = arith.constant 1.000000e+00 : f32
    %110 = vector.broadcast %cst_21 : f32 to vector<8x256xf32>
    %111 = arith.addf %110, %109 : vector<8x256xf32>
    %112 = arith.divf %110, %111 : vector<8x256xf32>
    %113 = vector.extract_strided_slice %112 {offsets = [0, 0], sizes = [8, 128], strides = [1, 1]} : vector<8x256xf32> to vector<8x128xf32>
    %114 = vector.extract_strided_slice %112 {offsets = [0, 128], sizes = [8, 128], strides = [1, 1]} : vector<8x256xf32> to vector<8x128xf32>
    %115 = vector.extract_strided_slice %102 {offsets = [0, 256], sizes = [8, 128], strides = [1, 1]} : vector<8x384xf32> to vector<8x128xf32>
    %116 = vector.extract_strided_slice %104 {offsets = [0, 256], sizes = [8, 128], strides = [1, 1]} : vector<8x384xf32> to vector<8x128xf32>
    %117 = arith.addf %116, %7 : vector<8x128xf32>
    %118 = arith.mulf %113, %117 : vector<8x128xf32>
    %119 = arith.addf %115, %118 : vector<8x128xf32>
    %120 = math.tanh %119 : vector<8x128xf32>
    %121 = arith.subf %101, %120 : vector<8x128xf32>
    %122 = arith.mulf %114, %121 : vector<8x128xf32>
    %123 = arith.addf %120, %122 : vector<8x128xf32>
    %124 = vector.extract_strided_slice %12 {offsets = [40, 0], sizes = [8, 384], strides = [1, 1]} : vector<64x384xf32> to vector<8x384xf32>
    %125 = arith.truncf %123 : vector<8x128xf32> to vector<8x128xbf16>
    %cst_22 = arith.constant dense<0.000000e+00> : vector<8x384xf32>
    %126 = tpu.matmul %125, %1, %cst_22 {dimension_numbers = #tpu.dot_dimension_numbers<[1], [0], [0], [1], [0, 0, 1, 1], [], []>} : vector<8x128xbf16>, vector<128x384xbf16>, vector<8x384xf32> -> vector<8x384xf32>
    %127 = vector.extract_strided_slice %124 {offsets = [0, 0], sizes = [8, 256], strides = [1, 1]} : vector<8x384xf32> to vector<8x256xf32>
    %128 = vector.extract_strided_slice %126 {offsets = [0, 0], sizes = [8, 256], strides = [1, 1]} : vector<8x384xf32> to vector<8x256xf32>
    %129 = arith.addf %127, %128 : vector<8x256xf32>
    %130 = arith.negf %129 : vector<8x256xf32>
    %131 = math.exp %130 : vector<8x256xf32>
    %cst_23 = arith.constant 1.000000e+00 : f32
    %132 = vector.broadcast %cst_23 : f32 to vector<8x256xf32>
    %133 = arith.addf %132, %131 : vector<8x256xf32>
    %134 = arith.divf %132, %133 : vector<8x256xf32>
    %135 = vector.extract_strided_slice %134 {offsets = [0, 0], sizes = [8, 128], strides = [1, 1]} : vector<8x256xf32> to vector<8x128xf32>
    %136 = vector.extract_strided_slice %134 {offsets = [0, 128], sizes = [8, 128], strides = [1, 1]} : vector<8x256xf32> to vector<8x128xf32>
    %137 = vector.extract_strided_slice %124 {offsets = [0, 256], sizes = [8, 128], strides = [1, 1]} : vector<8x384xf32> to vector<8x128xf32>
    %138 = vector.extract_strided_slice %126 {offsets = [0, 256], sizes = [8, 128], strides = [1, 1]} : vector<8x384xf32> to vector<8x128xf32>
    %139 = arith.addf %138, %7 : vector<8x128xf32>
    %140 = arith.mulf %135, %139 : vector<8x128xf32>
    %141 = arith.addf %137, %140 : vector<8x128xf32>
    %142 = math.tanh %141 : vector<8x128xf32>
    %143 = arith.subf %123, %142 : vector<8x128xf32>
    %144 = arith.mulf %136, %143 : vector<8x128xf32>
    %145 = arith.addf %142, %144 : vector<8x128xf32>
    %146 = vector.extract_strided_slice %12 {offsets = [48, 0], sizes = [8, 384], strides = [1, 1]} : vector<64x384xf32> to vector<8x384xf32>
    %147 = arith.truncf %145 : vector<8x128xf32> to vector<8x128xbf16>
    %cst_24 = arith.constant dense<0.000000e+00> : vector<8x384xf32>
    %148 = tpu.matmul %147, %1, %cst_24 {dimension_numbers = #tpu.dot_dimension_numbers<[1], [0], [0], [1], [0, 0, 1, 1], [], []>} : vector<8x128xbf16>, vector<128x384xbf16>, vector<8x384xf32> -> vector<8x384xf32>
    %149 = vector.extract_strided_slice %146 {offsets = [0, 0], sizes = [8, 256], strides = [1, 1]} : vector<8x384xf32> to vector<8x256xf32>
    %150 = vector.extract_strided_slice %148 {offsets = [0, 0], sizes = [8, 256], strides = [1, 1]} : vector<8x384xf32> to vector<8x256xf32>
    %151 = arith.addf %149, %150 : vector<8x256xf32>
    %152 = arith.negf %151 : vector<8x256xf32>
    %153 = math.exp %152 : vector<8x256xf32>
    %cst_25 = arith.constant 1.000000e+00 : f32
    %154 = vector.broadcast %cst_25 : f32 to vector<8x256xf32>
    %155 = arith.addf %154, %153 : vector<8x256xf32>
    %156 = arith.divf %154, %155 : vector<8x256xf32>
    %157 = vector.extract_strided_slice %156 {offsets = [0, 0], sizes = [8, 128], strides = [1, 1]} : vector<8x256xf32> to vector<8x128xf32>
    %158 = vector.extract_strided_slice %156 {offsets = [0, 128], sizes = [8, 128], strides = [1, 1]} : vector<8x256xf32> to vector<8x128xf32>
    %159 = vector.extract_strided_slice %146 {offsets = [0, 256], sizes = [8, 128], strides = [1, 1]} : vector<8x384xf32> to vector<8x128xf32>
    %160 = vector.extract_strided_slice %148 {offsets = [0, 256], sizes = [8, 128], strides = [1, 1]} : vector<8x384xf32> to vector<8x128xf32>
    %161 = arith.addf %160, %7 : vector<8x128xf32>
    %162 = arith.mulf %157, %161 : vector<8x128xf32>
    %163 = arith.addf %159, %162 : vector<8x128xf32>
    %164 = math.tanh %163 : vector<8x128xf32>
    %165 = arith.subf %145, %164 : vector<8x128xf32>
    %166 = arith.mulf %158, %165 : vector<8x128xf32>
    %167 = arith.addf %164, %166 : vector<8x128xf32>
    %168 = vector.extract_strided_slice %12 {offsets = [56, 0], sizes = [8, 384], strides = [1, 1]} : vector<64x384xf32> to vector<8x384xf32>
    %169 = arith.truncf %167 : vector<8x128xf32> to vector<8x128xbf16>
    %cst_26 = arith.constant dense<0.000000e+00> : vector<8x384xf32>
    %170 = tpu.matmul %169, %1, %cst_26 {dimension_numbers = #tpu.dot_dimension_numbers<[1], [0], [0], [1], [0, 0, 1, 1], [], []>} : vector<8x128xbf16>, vector<128x384xbf16>, vector<8x384xf32> -> vector<8x384xf32>
    %171 = vector.extract_strided_slice %168 {offsets = [0, 0], sizes = [8, 256], strides = [1, 1]} : vector<8x384xf32> to vector<8x256xf32>
    %172 = vector.extract_strided_slice %170 {offsets = [0, 0], sizes = [8, 256], strides = [1, 1]} : vector<8x384xf32> to vector<8x256xf32>
    %173 = arith.addf %171, %172 : vector<8x256xf32>
    %174 = arith.negf %173 : vector<8x256xf32>
    %175 = math.exp %174 : vector<8x256xf32>
    %cst_27 = arith.constant 1.000000e+00 : f32
    %176 = vector.broadcast %cst_27 : f32 to vector<8x256xf32>
    %177 = arith.addf %176, %175 : vector<8x256xf32>
    %178 = arith.divf %176, %177 : vector<8x256xf32>
    %179 = vector.extract_strided_slice %178 {offsets = [0, 0], sizes = [8, 128], strides = [1, 1]} : vector<8x256xf32> to vector<8x128xf32>
    %180 = vector.extract_strided_slice %178 {offsets = [0, 128], sizes = [8, 128], strides = [1, 1]} : vector<8x256xf32> to vector<8x128xf32>
    %181 = vector.extract_strided_slice %168 {offsets = [0, 256], sizes = [8, 128], strides = [1, 1]} : vector<8x384xf32> to vector<8x128xf32>
    %182 = vector.extract_strided_slice %170 {offsets = [0, 256], sizes = [8, 128], strides = [1, 1]} : vector<8x384xf32> to vector<8x128xf32>
    %183 = arith.addf %182, %7 : vector<8x128xf32>
    %184 = arith.mulf %179, %183 : vector<8x128xf32>
    %185 = arith.addf %181, %184 : vector<8x128xf32>
    %186 = math.tanh %185 : vector<8x128xf32>
    %187 = arith.subf %167, %186 : vector<8x128xf32>
    %188 = arith.mulf %180, %187 : vector<8x128xf32>
    %189 = arith.addf %186, %188 : vector<8x128xf32>
    %190 = tpu.concatenate %35, %57, %79, %101, %123, %145, %167, %189 in 0 : vector<8x128xf32>, vector<8x128xf32>, vector<8x128xf32>, vector<8x128xf32>, vector<8x128xf32>, vector<8x128xf32>, vector<8x128xf32>, vector<8x128xf32> -> vector<64x128xf32>
    %191 = vector.extract_strided_slice %8 {offsets = [0, 8], sizes = [64, 1], strides = [1, 1]} : vector<64x16xf32> to vector<64x1xf32>
    %192 = vector.broadcast %191 : vector<64x1xf32> to vector<64x128xf32>
    %193 = arith.mulf %190, %192 : vector<64x128xf32>
    %cst_28 = arith.constant dense<0.000000e+00> : vector<128xf32>
    %194 = vector.multi_reduction <add>, %193, %cst_28 [0] : vector<64x128xf32> to vector<128xf32>
    %195 = vector.shape_cast %194 : vector<128xf32> to vector<1x128xf32>
    %cst_29 = arith.constant 6.250000e-02 : f32
    %196 = vector.broadcast %cst_29 : f32 to vector<1x128xf32>
    %197 = arith.mulf %195, %196 : vector<1x128xf32>
    %198 = arith.mulf %193, %190 : vector<64x128xf32>
    %cst_30 = arith.constant dense<0.000000e+00> : vector<128xf32>
    %199 = vector.multi_reduction <add>, %198, %cst_30 [0] : vector<64x128xf32> to vector<128xf32>
    %200 = vector.shape_cast %199 : vector<128xf32> to vector<1x128xf32>
    %cst_31 = arith.constant 6.250000e-02 : f32
    %201 = vector.broadcast %cst_31 : f32 to vector<1x128xf32>
    %202 = arith.mulf %200, %201 : vector<1x128xf32>
    %203 = arith.mulf %197, %197 : vector<1x128xf32>
    %204 = arith.subf %202, %203 : vector<1x128xf32>
    %cst_32 = arith.constant 9.99999974E-6 : f32
    %205 = vector.broadcast %cst_32 : f32 to vector<1x128xf32>
    %206 = arith.addf %204, %205 : vector<1x128xf32>
    %207 = math.rsqrt %206 : vector<1x128xf32>
    %208 = arith.mulf %5, %207 : vector<1x128xf32>
    %209 = arith.mulf %197, %208 : vector<1x128xf32>
    %210 = arith.subf %6, %209 : vector<1x128xf32>
    %211 = vector.broadcast %208 : vector<1x128xf32> to vector<64x128xf32>
    %212 = arith.mulf %190, %211 : vector<64x128xf32>
    %213 = vector.broadcast %210 : vector<1x128xf32> to vector<64x128xf32>
    %214 = arith.addf %212, %213 : vector<64x128xf32>
    %215 = arith.truncf %214 : vector<64x128xf32> to vector<64x128xbf16>
    %cst_33 = arith.constant dense<0.000000e+00> : vector<64x384xf32>
    %216 = tpu.matmul %215, %2, %cst_33 {dimension_numbers = #tpu.dot_dimension_numbers<[1], [0], [0], [1], [0, 0, 1, 1], [], []>} : vector<64x128xbf16>, vector<128x384xbf16>, vector<64x384xf32> -> vector<64x384xf32>
    %217 = vector.broadcast %4 : vector<1x384xf32> to vector<64x384xf32>
    %218 = arith.addf %216, %217 : vector<64x384xf32>
    %219 = vector.extract_strided_slice %218 {offsets = [0, 0], sizes = [64, 4], strides = [1, 1]} : vector<64x384xf32> to vector<64x4xf32>
    %220 = vector.extract_strided_slice %218 {offsets = [0, 128], sizes = [64, 4], strides = [1, 1]} : vector<64x384xf32> to vector<64x4xf32>
    %cst_34 = arith.constant 0.000000e+00 : f32
    %221 = vector.broadcast %cst_34 : f32 to vector<64x4xf32>
    %222 = arith.maximumf %220, %221 : vector<64x4xf32>
    %223 = vector.broadcast %cst_34 : f32 to vector<64x4xf32>
    %224 = arith.subf %220, %223 : vector<64x4xf32>
    %225 = arith.cmpf one, %224, %224 : vector<64x4xf32>
    %226 = vector.broadcast %cst_34 : f32 to vector<64x4xf32>
    %227 = arith.addf %220, %226 : vector<64x4xf32>
    %228 = math.absf %224 : vector<64x4xf32>
    %cst_35 = arith.constant 0.000000e+00 : f32
    %229 = vector.broadcast %cst_35 : f32 to vector<64x4xf32>
    %230 = arith.subf %229, %228 : vector<64x4xf32>
    %231 = math.exp %230 : vector<64x4xf32>
    %232 = math.log1p %231 : vector<64x4xf32>
    %233 = arith.addf %222, %232 : vector<64x4xf32>
    %234 = arith.select %225, %227, %233 : vector<64x4xi1>, vector<64x4xf32>
    %235 = vector.extract_strided_slice %218 {offsets = [0, 256], sizes = [64, 4], strides = [1, 1]} : vector<64x384xf32> to vector<64x4xf32>
    %236 = arith.negf %235 : vector<64x4xf32>
    %237 = math.exp %236 : vector<64x4xf32>
    %cst_36 = arith.constant 1.000000e+00 : f32
    %238 = vector.broadcast %cst_36 : f32 to vector<64x4xf32>
    %239 = arith.addf %238, %237 : vector<64x4xf32>
    %240 = arith.divf %238, %239 : vector<64x4xf32>
    %241 = vector.extract_strided_slice %8 {offsets = [0, 0], sizes = [64, 4], strides = [1, 1]} : vector<64x16xf32> to vector<64x4xf32>
    %242 = arith.mulf %240, %241 : vector<64x4xf32>
    %243 = arith.mulf %234, %242 : vector<64x4xf32>
    %244 = arith.addf %219, %243 : vector<64x4xf32>
    %c0_37 = arith.constant 0 : index
    %c0_38 = arith.constant 0 : index
    %245 = vector.load %arg3[%c0_37, %c0_38] : memref<64x4xf32, #tpu.memory_space<vmem>>, vector<64x4xf32>
    tpu.vector_store %arg3[%c0_37, %c0_38], %244 {strides = array<i32>} : memref<64x4xf32, #tpu.memory_space<vmem>>, vector<64x4xf32>,
    return
  }
}

</mosaic_0001>

<bundles_post_ra>
// kernel: grusde_forward.1
= control target key start
LH: loop header
LB: loop body
LE: loop exit
PB: predicated region body
PF: predicated region fallthrough
CT: control target
= control target key end

     0   :  { %v3489_v1 = vmov 0   ;;  %v2474_v5 = vmov 8   ;;  %vm133_vm0 = vcmask 130048   ;;  %v3491_v21 = vmov 0.0   ;;  %s3482_s1 = inlined_call_operand.vmem [shape: bf16[272,384], index: 1, kind: input, shape index: {}]   ;;  %s3483_s0 = inlined_call_operand.vmem [shape: f32[64,16], index: 0, kind: input, shape index: {}]   ;;  %s3484_s2 = inlined_call_operand.vmem [shape: f32[16,384], index: 2, kind: input, shape index: {}]   ;;  %s3485_s3 = inlined_call_operand.vmem [shape: f32[64,4], index: 3, kind: output, shape index: {}]  }
   0x1   :  { %v2230_v0 = vld [vmem:[%s3482_s1 + $0x4] ss:$12 sps:$4 sm:$0xff]   ;;  %178 = vmatprep.mubr.bf16.mxu0 %v3489_v1  ;;  %v2232_v2 = vld [vmem:[%s3482_s1] ss:$12 sps:$4 sm:$0xff]   ;;  %2228 = vset.pattern.permute.xlu0 %v2474_v5  ;;  %v2513_v7 = vld [vmem:[%s3482_s1 + $0x1c] ss:$12 sps:$4 sm:$0xff]   ;;  %v102_v42 = vlaneseq }
   0x2   :  { %v89_v3 = vld [vmem:[%s3483_s0] sm:$0xff]  ;;  %v90_v4 = vld [vmem:[%s3483_s0 + $0x8] sm:$0xff]  ;;  %2229 = vset.pattern.permute.xlu1 %v2474_v5  ;;  %146 = vmatprep.subr.bf16.mxu0 %v2230_v0  ;;  %v91_v10 = vld [vmem:[%s3483_s0 + $0x10] sm:$0xff]  ;;  %vm2476_vm1 = vmmov 0   ;;  %vm1844_vm3 = vcmask 31744  }
   0x3   :  { %v97_v6 = vpack.c.bf16 %v90_v4, %v89_v3  ;;  %1237 = vperm.xlu0 %2228, %v89_v3   ;;  %147 = vmatpush1.bf16.msra.mxu0 %v2232_v2  ;;  %v2518_v8 = vld [vmem:[%s3482_s1 + $0x18] ss:$12 sps:$4 sm:$0xff]   ;;  %v2524_v9 = vld [vmem:[%s3482_s1 + $0x34] ss:$12 sps:$4 sm:$0xff]   ;;  %v2535_v11 = vld [vmem:[%s3482_s1 + $0x30] ss:$12 sps:$4 sm:$0xff]  }
   0x4   :  { %412 = vmatprep.subr.bf16.mxu0 %v2513_v7  ;;  %1247 = vperm.xlu1 %2229, %v91_v10   ;;  %v92_v12 = vld [vmem:[%s3483_s0 + $0x18] sm:$0xff]  ;;  %v93_v14 = vld [vmem:[%s3483_s0 + $0x20] sm:$0xff]  ;;  %v2248_v16 = vld [vmem:[%s3482_s1 + $0x8] ss:$12 sps:$4 sm:$0xff]   ;;  %v2736_v43 = vshrl.u32 %v102_v42, 7 }
   0x5   :  { %2032 = vmatprep.mubr.msk.bf16.mxu1 %vm133_vm0, %v97_v6  ;;  %v2545_v13 = vld [vmem:[%s3482_s1 + $0x4c] ss:$12 sps:$4 sm:$0xff]   ;;  %v98_v15 = vpack.c.bf16 %v92_v12, %v91_v10  ;;  %v2557_v17 = vld [vmem:[%s3482_s1 + $0x48] ss:$12 sps:$4 sm:$0xff]   ;;  %v2563_v18 = vld [vmem:[%s3482_s1 + $0x64] ss:$12 sps:$4 sm:$0xff]   ;;  %2030 = vmatprep.subr.bf16.mxu1 %v2248_v16 }
   0x6   :  { %1861 = vmatmul.mubr.msk.bf16.vlgmr.msra.gmra.mrb[0].mxu0 %vm133_vm0, %v97_v6  ;;  %v94_v19 = vld [vmem:[%s3483_s0 + $0x28] sm:$0xff]  ;;  %2031 = vmatpush3.bf16.msra.mxu1 %v2248_v16  ;;  %v95_v25 = vld [vmem:[%s3483_s0 + $0x30] sm:$0xff]  ;;  %v2596_v26 = vld [vmem:[%s3482_s1 + $0x38] ss:$12 sps:$4 sm:$0xff]   ;;  %3495 = vst [vmem:[#allocation2_spill] sm:$0xff] %v2736_v43  ;;  %v3486_v44 = vsub.s32 0, %v2736_v43 }
   0x7   :  { %1242 = vperm.xlu0 %2228, %v90_v4   ;;  %413 = vmatpush1.bf16.msra.mxu0 %v2518_v8  ;;  %v2572_v20 = vld [vmem:[%s3482_s1 + $0x60] ss:$12 sps:$4 sm:$0xff]   ;;  %v99_v22 = vpack.c.bf16 %v94_v19, %v93_v14  ;;  %v2586_v24 = vld [vmem:[%s3482_s1 + $0x7c] ss:$12 sps:$4 sm:$0xff]   ;;  %v2607_v28 = vld [vmem:[%s3482_s1 + $0x78] ss:$12 sps:$4 sm:$0xff]  }
   0x8   :  { %188 = vmatprep.mubr.bf16.mxu0 %v3489_v1  ;;  %414 = vmatprep.subr.bf16.mxu0 %v2524_v9  ;;  %v2580_v23 = vld [vmem:[%s3482_s1 + $0x20] ss:$12 sps:$4 sm:$0xff]   ;;  %v96_v27 = vld [vmem:[%s3483_s0 + $0x38] sm:$0xff]  ;;  %v2639_v34 = vld [vmem:[%s3482_s1 + $0x68] ss:$12 sps:$4 sm:$0xff]   ;;  %v3488_v46 = vsub.s32 1, %v2736_v43 }
   0x9   :  { %1252 = vperm.xlu1 %2229, %v92_v12   ;;  %2040 = vmatprep.subr.bf16.mxu1 %v3491_v21  ;;  %v2613_v29 = vld [vmem:[%s3482_s1 + $0x94] ss:$12 sps:$4 sm:$0xff]   ;;  %v2619_v30 = vld [vmem:[%s3482_s1 + $0x50] ss:$12 sps:$4 sm:$0xff]   ;;  %v100_v32 = vpack.c.bf16 %v96_v27, %v95_v25  ;;  %v2633_v33 = vld [vmem:[%s3482_s1 + $0xac] ss:$12 sps:$4 sm:$0xff]  }
   0xa   :  { %2033 = vmatmul.mubr.msk.bf16.vlgmr.msra.gmra.mrb[0].mxu1 %vm133_vm0, %v98_v15  ;;  %v2625_v31 = vld [vmem:[%s3482_s1 + $0x90] ss:$12 sps:$4 sm:$0xff]   ;;  %v2645_v35 = vld [vmem:[%s3482_s1 + $0xa8] ss:$12 sps:$4 sm:$0xff]   ;;  %v2660_v37 = vld [vmem:[%s3482_s1 + $0x80] ss:$12 sps:$4 sm:$0xff]  }
   0xb   :  { %1257 = vperm.xlu0 %2228, %v93_v14   ;;  %415 = vmatpush1.bf16.msra.mxu0 %v2535_v11  ;;  %v2653_v36 = vld [vmem:[%s3482_s1 + $0xc4] ss:$12 sps:$4 sm:$0xff]   ;;  %v2666_v38 = vld [vmem:[%s3482_s1 + $0xc0] ss:$12 sps:$4 sm:$0xff]   ;;  %v2698_v41 = vld [vmem:[%s3482_s1 + $0xc8] ss:$12 sps:$4 sm:$0xff]  }
   0xc   :  { %416 = vmatprep.subr.bf16.mxu0 %v2545_v13  ;;  %2041 = vmatpush3.bf16.msra.mxu1 %v2580_v23  ;;  %v2676_v39 = vld [vmem:[%s3482_s1 + $0x98] ss:$12 sps:$4 sm:$0xff]   ;;  %v2687_v40 = vld [vmem:[%s3482_s1 + $0xb0] ss:$12 sps:$4 sm:$0xff]   ;;  %v3487_v54 = vsub.s32 2, %v2736_v43 }
   0xd   :  { %1262 = vperm.xlu1 %2229, %v94_v19   ;;  %2036 = vmatprep.mubr.msk.bf16.mxu1 %vm133_vm0, %v99_v22  ;;  %v83_v45 = vld [vmem:[%s3484_s2] ss:$8 sm:$0x7] }
   0xe   :  { %1862 = vmatmul.mubr.msk.bf16.gmra.mrb[4].mxu0 %vm133_vm0, %v98_v15  ;;  %2042 = vmatprep.subr.bf16.mxu1 %v3491_v21  ;;  %v105_v48 = vrot.slane %v83_v45, %v3486_v44  ;;  %v109_v50 = vrot.slane %v83_v45, %v3488_v46  ;;  %v2754_v56 = vrot.slane %v83_v45, %v3487_v54 }
   0xf   :  { %417 = vmatpush1.bf16.msra.mxu0 %v2557_v17  ;;  %198 = vmatprep.mubr.bf16.mxu0 %v3489_v1 }
  0x10   :  { %418 = vmatprep.subr.bf16.mxu0 %v2563_v18  ;;  %1267 = vperm.xlu0 %2228, %v95_v25  }
  0x11   :  { %1272 = vperm.xlu1 %2229, %v96_v27   ;;  %2043 = vmatpush3.bf16.msra.mxu1 %v2596_v26 }
  0x12   :  { %2044 = vmatprep.subr.bf16.mxu1 %v3491_v21  ;;  %2037 = vmatmul.mubr.msk.bf16.gmra.mrb[4].mxu1 %vm133_vm0, %v100_v32 }
  0x13   :  { %419 = vmatpush1.bf16.msra.mxu0 %v2572_v20  ;;  %2056 = vmatprep.mubr.msk.bf16.mxu1 %vm2476_vm1, %v3491_v21 }
  0x14   :  { %420 = vmatprep.subr.bf16.mxu0 %v2586_v24 }
  0x15   :  { %2045 = vmatpush3.bf16.msra.mxu1 %v2619_v30 }
  0x16   :  { %1863 = vmatmul.mubr.msk.bf16.gmra.mrb[8].mxu0 %vm133_vm0, %v99_v22  ;;  %2046 = vmatprep.subr.bf16.mxu1 %v3491_v21 }
  0x17   :  { %421 = vmatpush1.bf16.msra.mxu0 %v2607_v28  ;;  %208 = vmatprep.mubr.bf16.mxu0 %v3489_v1 }
  0x18   :  { %422 = vmatprep.subr.bf16.mxu0 %v2613_v29 }
  0x19   :  { %2047 = vmatpush3.bf16.msra.mxu1 %v2639_v34 }
  0x1a   :  { %2048 = vmatprep.subr.bf16.mxu1 %v3491_v21 }
  0x1b   :  { %423 = vmatpush1.bf16.msra.mxu0 %v2625_v31 }
  0x1c   :  { %424 = vmatprep.subr.bf16.mxu0 %v2633_v33 }
  0x1d   :  { %2049 = vmatpush3.bf16.msra.mxu1 %v2660_v37 }
  0x1e   :  { %1864 = vmatmul.mubr.msk.bf16.gmra.mrb[12].mxu0 %vm133_vm0, %v100_v32  ;;  %2050 = vmatprep.subr.bf16.mxu1 %v3491_v21 }
  0x1f   :  { %425 = vmatpush1.bf16.msra.mxu0 %v2645_v35  ;;  %444 = vmatprep.mubr.bf16.mxu0 %v3489_v1 }
  0x20   :  { %426 = vmatprep.subr.bf16.mxu0 %v2653_v36 }
  0x21   :  { %2051 = vmatpush3.bf16.msra.mxu1 %v2676_v39 }
  0x22   :  { %2052 = vmatprep.subr.bf16.mxu1 %v3491_v21 }
  0x23   :  { %427 = vmatpush1.bf16.msra.mxu0 %v2666_v38 }
  0x24   :  { %515 = vmatprep.subr.bf16.mxu0 %v2513_v7 }
  0x25   :  { %2053 = vmatpush3.bf16.msra.mxu1 %v2687_v40 }
  0x26   :  { %445 = vmatmul.mubr.bf16.vlgmr.msra.gmra.mrb[16].mxu0 %v3489_v1  ;;  %2054 = vmatprep.subr.bf16.mxu1 %v3491_v21 }
  0x27   :  { %516 = vmatpush1.bf16.msra.mxu0 %v2518_v8  ;;  %547 = vmatprep.mubr.bf16.mxu0 %v3489_v1 }
  0x28   :  { %517 = vmatprep.subr.bf16.mxu0 %v2524_v9 }
  0x29   :  { %2055 = vmatpush3.bf16.msra.mxu1 %v2698_v41 }
  0x2a   :  { %2060 = vmatprep.subr.bf16.mxu1 %v3491_v21 }
  0x2b   :  { %518 = vmatpush1.bf16.msra.mxu0 %v2535_v11 }
  0x2c   :  { %519 = vmatprep.subr.bf16.mxu0 %v2545_v13  ;;  %2057 = vmatmul.mubr.bf16.vlgmr.msra.gmra.mrb[8].mxu1 %v3489_v1 }
  0x2d   :  { %2061 = vmatpush3.bf16.msra.mxu1 %v2580_v23  ;;  %2076 = vmatprep.mubr.msk.bf16.mxu1 %vm2476_vm1, %v3491_v21 }
  0x2e   :  { %2062 = vmatprep.subr.bf16.mxu1 %v3491_v21 }
  0x2f   :  { %520 = vmatpush1.bf16.msra.mxu0 %v2557_v17 }
  0x30   :  { %521 = vmatprep.subr.bf16.mxu0 %v2563_v18 }
  0x31   :  { %2063 = vmatpush3.bf16.msra.mxu1 %v2596_v26 }
  0x32   :  { %2064 = vmatprep.subr.bf16.mxu1 %v3491_v21 }
  0x33   :  { %522 = vmatpush1.bf16.msra.mxu0 %v2572_v20 }
  0x34   :  { %523 = vmatprep.subr.bf16.mxu0 %v2586_v24 }
  0x35   :  { %2065 = vmatpush3.bf16.msra.mxu1 %v2619_v30 }
  0x36   :  { %2066 = vmatprep.subr.bf16.mxu1 %v3491_v21 }
  0x37   :  { %524 = vmatpush1.bf16.msra.mxu0 %v2607_v28 }
  0x38   :  { %525 = vmatprep.subr.bf16.mxu0 %v2613_v29 }
  0x39   :  { %2067 = vmatpush3.bf16.msra.mxu1 %v2639_v34 }
  0x3a   :  { %2068 = vmatprep.subr.bf16.mxu1 %v3491_v21 }
  0x3b   :  { %526 = vmatpush1.bf16.msra.mxu0 %v2625_v31 }
  0x3c   :  { %527 = vmatprep.subr.bf16.mxu0 %v2633_v33 }
  0x3d   :  { %2069 = vmatpush3.bf16.msra.mxu1 %v2660_v37 }
  0x3e   :  { %2070 = vmatprep.subr.bf16.mxu1 %v3491_v21 }
  0x3f   :  { %528 = vmatpush1.bf16.msra.mxu0 %v2645_v35 }
  0x40   :  { %529 = vmatprep.subr.bf16.mxu0 %v2653_v36 }
  0x41   :  { %2071 = vmatpush3.bf16.msra.mxu1 %v2676_v39 }
  0x42   :  { %2072 = vmatprep.subr.bf16.mxu1 %v3491_v21 }
  0x43   :  { %530 = vmatpush1.bf16.msra.mxu0 %v2666_v38 }
  0x44   :  { %618 = vmatprep.subr.bf16.mxu0 %v2513_v7 }
  0x45   :  { %2073 = vmatpush3.bf16.msra.mxu1 %v2687_v40 }
  0x46   :  { %2074 = vmatprep.subr.bf16.mxu1 %v3491_v21 }
  0x49   :  { %2075 = vmatpush3.bf16.msra.mxu1 %v2698_v41 }
  0x4a   :  { %2080 = vmatprep.subr.bf16.mxu1 %v3491_v21 }
  0xd9   :  { %v180_v47 = vpop.f32.mrb[0].mxu0 }
  0xda   :  { %v182_v49 = vpop.f32.mrb[1].mxu0 }
  0xdb   :  { %v184_v51 = vpop.f32.mrb[2].mxu0  ;;  %v183_v44 = vadd.f32 %v182_v49, %v109_v50 }
  0xdc   :  { %v2747_v52 = vadd.f32 %v184_v51, %v105_v48  ;;  %v186_v53 = vpop.f32.mrb[3].mxu0 }
  0xdd   :  { %v2750_v55 = vadd.f32 %v186_v53, %v109_v50  ;;  %v2034_v62 = vpop.f32.mrb[0].mxu1 }
  0xde   :  { %v2763_v2 = vadd.f32 %v2034_v62, %v2754_v56  ;;  %v253_v3 = vpop.f32.mrb[1].mxu1 }
  0xdf   :  { %v2035_v5 = vpop.f32.mrb[2].mxu1 }
  0xe0   :  { %v2768_v6 = vadd.f32 %v2035_v5, %v2754_v56  ;;  %v256_v10 = vpop.f32.mrb[3].mxu1 }
  0xe1   :  { %v190_v57 = vpop.f32.mrb[4].mxu0  ;;  %v2771_v12 = vadd.f32 %v256_v10, %v2754_v56 }
  0xe2   :  { %v2756_v58 = vadd.f32 %v190_v57, %v105_v48  ;;  %v192_v59 = vpop.f32.mrb[5].mxu0 }
  0xe3   :  { %v2758_v60 = vadd.f32 %v192_v59, %v109_v50  ;;  %v194_v61 = vpop.f32.mrb[6].mxu0 }
  0xe4   :  { %v2760_v63 = vadd.f32 %v194_v61, %v105_v48  ;;  %v196_v0 = vpop.f32.mrb[7].mxu0 }
  0xe5   :  { %v2765_v4 = vadd.f32 %v196_v0, %v109_v50  ;;  %v2038_v25 = vpop.f32.mrb[4].mxu1 }
  0xe6   :  { %v2780_v42 = vadd.f32 %v2038_v25, %v2754_v56  ;;  %v269_v45 = vpop.f32.mrb[5].mxu1 }
  0xe7   :  { %v2785_v53 = vadd.f32 %v269_v45, %v2754_v56  ;;  %v2039_v57 = vpop.f32.mrb[6].mxu1  ;;  %v181_v45 = vadd.f32 %v180_v47, %v105_v48  ;;  %v2804_v47 = vld [vmem:[%s3484_s2 + $0x18] sm:$0xff] }
  0xe8   :  { %3496 = vst [vmem:[#allocation3_spill] sm:$0xff] %v2780_v42  ;;  %v2788_v59 = vadd.f32 %v2039_v57, %v2754_v56  ;;  %v272_v61 = vpop.f32.mrb[7].mxu1 }
  0xe9   :  { %v200_v14 = vpop.f32.mrb[8].mxu0  ;;  %v2791_v62 = vadd.f32 %v272_v61, %v2754_v56 }
  0xea   :  { %v2773_v15 = vadd.f32 %v200_v14, %v105_v48  ;;  %v202_v16 = vpop.f32.mrb[9].mxu0  ;;  %3497 = vst [vmem:[#allocation4_spill] sm:$0xff] %v2788_v59 }
  0xeb   :  { %v2775_v19 = vadd.f32 %v202_v16, %v109_v50  ;;  %v204_v22 = vpop.f32.mrb[10].mxu0 }
  0xec   :  { %v2777_v27 = vadd.f32 %v204_v22, %v105_v48  ;;  %v206_v32 = vpop.f32.mrb[11].mxu0 }
  0xed   :  { %v2782_v51 = vadd.f32 %v206_v32, %v109_v50 }
  0xf1   :  { %v210_v0 = vpop.f32.mrb[12].mxu0 }
  0xf2   :  { %v2793_v5 = vadd.f32 %v210_v0, %v105_v48  ;;  %v212_v10 = vpop.f32.mrb[13].mxu0 }
  0xf3   :  { %v2795_v14 = vadd.f32 %v212_v10, %v109_v50  ;;  %v214_v16 = vpop.f32.mrb[14].mxu0 }
  0xf4   :  { %v2797_v22 = vadd.f32 %v214_v16, %v105_v48  ;;  %v216_v25 = vpop.f32.mrb[15].mxu0 }
  0xf5   :  { %3498 = vst [vmem:[#allocation5_spill] sm:$0xff] %v2795_v14  ;;  %v2799_v32 = vadd.f32 %v216_v25, %v109_v50 }
  0xf6   :  { %3499 = vst [vmem:[#allocation6_spill] sm:$0xff] %v2797_v22 }
  0xf9   :  { %v446_v57 = vpop.f32.mrb[16].mxu0 }
  0xfa   :  { %v493_v54 = vadd.f32 %v446_v57, %v181_v45  ;;  %v448_v46 = vpop.f32.mrb[17].mxu0 }
  0xfb   :  { %v494_v1 = vadd.f32 %v448_v46, %v183_v44  ;;  %v450_v61 = vpop.f32.mrb[18].mxu0 }
  0xfc   :  { %v1893_v21 = vmul.f32 -1.442695, %v493_v54  ;;  %v451_v43 = vpop.f32.mrb[19].mxu0 }
  0xfd   :  { %v1894_v42 = vmul.f32 -1.442695, %v494_v1 }
  0xfe   :  { %2298 = vpow2.f32 %v1893_v21  ;;  %v254_v21 = vadd.f32 %v253_v3, %v2754_v56  ;;  %v3500_v56 = vmov 0.0   ;;  %v3501_v3 = vmov 0  }
  0xff   :  { %v487_v0 = vpop.f32.mrb[8].mxu1  ;;  %2300 = vpow2.f32 %v1894_v42 }
 0x100   :  { %v2058_v59 = vpop.f32.mrb[9].mxu1  ;;  %v507_v44 = vadd.f32 %v487_v0, %v2804_v47 }
 0x101   :  { %v490_v10 = vpop.f32.mrb[10].mxu1 }
 0x102   :  { %v2059_v14 = vpop.f32.mrb[11].mxu1 }
 0x108   :  { %v2299_v16 = vpop.eup %2298 }
 0x109   :  { %v501_v22 = vadd.f32 1.0, %v2299_v16  ;;  %v2301_v46 = vpop.eup %2300 }
 0x10a   :  { %v502_v49 = vadd.f32 1.0, %v2301_v46 }
 0x10b   :  { %2302 = vrcp.f32 %v501_v22 }
 0x115   :  { %v2303_v48 = vpop.eup %2302 }
 0x116   :  { %v508_v43 = vmul.f32 %v2303_v48, %v507_v44 }
 0x118   :  { %v509_v50 = vadd.f32 %v508_v43, %v254_v21 }
 0x11a   :  { %2304 = vtanh.f32 %v509_v50 }
 0x11b   :  { %2306 = vrcp.f32 %v502_v49 }
 0x124   :  { %v2305_v1 = vpop.eup %2304 }
 0x125   :  { %v511_v54 = vsub.f32 0.0, %v2305_v1  ;;  %v2307_v42 = vpop.eup %2306 }
 0x127   :  { %v512_v59 = vmul.f32 %v2307_v42, %v511_v54 }
 0x129   :  { %v2808_v14 = vadd.f32 %v2305_v1, %v512_v59 }
 0x12b   :  { %v514_v22 = vpack.c.bf16 %v2808_v14, %v2808_v14 }
 0x12d   :  { %548 = vmatmul.mubr.bf16.vlgmr.msra.gmra.mrb[20].mxu0 %v514_v22  ;;  %2077 = vmatmul.mubr.bf16.vlgmr.msra.gmra.mrb[12].mxu1 %v514_v22 }
 0x12e   :  { %619 = vmatpush1.bf16.msra.mxu0 %v2518_v8  ;;  %2081 = vmatpush3.bf16.msra.mxu1 %v2580_v23 }
 0x12f   :  { %620 = vmatprep.subr.bf16.mxu0 %v2524_v9  ;;  %2082 = vmatprep.subr.bf16.mxu1 %v3500_v56 }
 0x130   :  { %650 = vmatprep.mubr.bf16.mxu0 %v3501_v3  ;;  %2096 = vmatprep.mubr.msk.bf16.mxu1 %vm2476_vm1, %v3500_v56 }
 0x132   :  { %621 = vmatpush1.bf16.msra.mxu0 %v2535_v11  ;;  %2083 = vmatpush3.bf16.msra.mxu1 %v2596_v26 }
 0x133   :  { %622 = vmatprep.subr.bf16.mxu0 %v2545_v13  ;;  %2084 = vmatprep.subr.bf16.mxu1 %v3500_v56 }
 0x136   :  { %623 = vmatpush1.bf16.msra.mxu0 %v2557_v17  ;;  %2085 = vmatpush3.bf16.msra.mxu1 %v2619_v30 }
 0x137   :  { %624 = vmatprep.subr.bf16.mxu0 %v2563_v18  ;;  %2086 = vmatprep.subr.bf16.mxu1 %v3500_v56 }
 0x13a   :  { %625 = vmatpush1.bf16.msra.mxu0 %v2572_v20  ;;  %2087 = vmatpush3.bf16.msra.mxu1 %v2639_v34 }
 0x13b   :  { %626 = vmatprep.subr.bf16.mxu0 %v2586_v24  ;;  %2088 = vmatprep.subr.bf16.mxu1 %v3500_v56 }
 0x13e   :  { %627 = vmatpush1.bf16.msra.mxu0 %v2607_v28  ;;  %2089 = vmatpush3.bf16.msra.mxu1 %v2660_v37 }
 0x13f   :  { %628 = vmatprep.subr.bf16.mxu0 %v2613_v29  ;;  %2090 = vmatprep.subr.bf16.mxu1 %v3500_v56 }
 0x142   :  { %629 = vmatpush1.bf16.msra.mxu0 %v2625_v31  ;;  %2091 = vmatpush3.bf16.msra.mxu1 %v2676_v39 }
 0x143   :  { %630 = vmatprep.subr.bf16.mxu0 %v2633_v33  ;;  %2092 = vmatprep.subr.bf16.mxu1 %v3500_v56 }
 0x146   :  { %631 = vmatpush1.bf16.msra.mxu0 %v2645_v35  ;;  %2093 = vmatpush3.bf16.msra.mxu1 %v2687_v40 }
 0x147   :  { %632 = vmatprep.subr.bf16.mxu0 %v2653_v36  ;;  %2094 = vmatprep.subr.bf16.mxu1 %v3500_v56 }
 0x14a   :  { %633 = vmatpush1.bf16.msra.mxu0 %v2666_v38  ;;  %2095 = vmatpush3.bf16.msra.mxu1 %v2698_v41 }
 0x14b   :  { %721 = vmatprep.subr.bf16.mxu0 %v2513_v7  ;;  %2100 = vmatprep.subr.bf16.mxu1 %v3500_v56 }
 0x200   :  { %v549_v25 = vpop.f32.mrb[20].mxu0  ;;  %v590_v45 = vpop.f32.mrb[12].mxu1 }
 0x201   :  { %v596_v57 = vadd.f32 %v549_v25, %v2747_v52  ;;  %v551_v61 = vpop.f32.mrb[21].mxu0  ;;  %v2078_v0 = vpop.f32.mrb[13].mxu1  ;;  %v610_v54 = vadd.f32 %v590_v45, %v2804_v47 }
 0x202   :  { %v597_v10 = vadd.f32 %v551_v61, %v2750_v55  ;;  %v553_v16 = vpop.f32.mrb[22].mxu0  ;;  %v593_v44 = vpop.f32.mrb[14].mxu1 }
 0x203   :  { %v1895_v46 = vmul.f32 -1.442695, %v596_v57  ;;  %v554_v48 = vpop.f32.mrb[23].mxu0  ;;  %v2079_v21 = vpop.f32.mrb[15].mxu1 }
 0x204   :  { %v1896_v43 = vmul.f32 -1.442695, %v597_v10 }
 0x205   :  { %2308 = vpow2.f32 %v1895_v46 }
 0x206   :  { %2310 = vpow2.f32 %v1896_v43 }
 0x20f   :  { %v2309_v49 = vpop.eup %2308 }
 0x210   :  { %v604_v50 = vadd.f32 1.0, %v2309_v49  ;;  %v2311_v1 = vpop.eup %2310 }
 0x211   :  { %v605_v22 = vadd.f32 1.0, %v2311_v1 }
 0x212   :  { %2312 = vrcp.f32 %v604_v50 }
 0x21c   :  { %v2313_v42 = vpop.eup %2312 }
 0x21d   :  { %v611_v52 = vmul.f32 %v2313_v42, %v610_v54 }
 0x21f   :  { %v612_v59 = vadd.f32 %v611_v52, %v2771_v12 }
 0x221   :  { %2314 = vtanh.f32 %v612_v59 }
 0x222   :  { %2316 = vrcp.f32 %v605_v22 }
 0x22b   :  { %v2315_v55 = vpop.eup %2314 }
 0x22c   :  { %v614_v25 = vsub.f32 %v2808_v14, %v2315_v55  ;;  %v2317_v57 = vpop.eup %2316 }
 0x22e   :  { %v615_v61 = vmul.f32 %v2317_v57, %v614_v25 }
 0x230   :  { %v2852_v0 = vadd.f32 %v2315_v55, %v615_v61 }
 0x232   :  { %v617_v10 = vpack.c.bf16 %v2852_v0, %v2852_v0 }
 0x234   :  { %651 = vmatmul.mubr.bf16.vlgmr.msra.gmra.mrb[24].mxu0 %v617_v10  ;;  %2097 = vmatmul.mubr.bf16.vlgmr.msra.gmra.mrb[16].mxu1 %v617_v10 }
 0x235   :  { %722 = vmatpush1.bf16.msra.mxu0 %v2518_v8  ;;  %2101 = vmatpush3.bf16.msra.mxu1 %v2580_v23 }
 0x236   :  { %723 = vmatprep.subr.bf16.mxu0 %v2524_v9  ;;  %2102 = vmatprep.subr.bf16.mxu1 %v3500_v56 }
 0x237   :  { %753 = vmatprep.mubr.bf16.mxu0 %v3501_v3  ;;  %2116 = vmatprep.mubr.msk.bf16.mxu1 %vm2476_vm1, %v3500_v56 }
 0x239   :  { %724 = vmatpush1.bf16.msra.mxu0 %v2535_v11  ;;  %2103 = vmatpush3.bf16.msra.mxu1 %v2596_v26 }
 0x23a   :  { %725 = vmatprep.subr.bf16.mxu0 %v2545_v13  ;;  %2104 = vmatprep.subr.bf16.mxu1 %v3500_v56 }
 0x23d   :  { %726 = vmatpush1.bf16.msra.mxu0 %v2557_v17  ;;  %2105 = vmatpush3.bf16.msra.mxu1 %v2619_v30 }
 0x23e   :  { %727 = vmatprep.subr.bf16.mxu0 %v2563_v18  ;;  %2106 = vmatprep.subr.bf16.mxu1 %v3500_v56 }
 0x241   :  { %728 = vmatpush1.bf16.msra.mxu0 %v2572_v20  ;;  %2107 = vmatpush3.bf16.msra.mxu1 %v2639_v34 }
 0x242   :  { %729 = vmatprep.subr.bf16.mxu0 %v2586_v24  ;;  %2108 = vmatprep.subr.bf16.mxu1 %v3500_v56 }
 0x245   :  { %730 = vmatpush1.bf16.msra.mxu0 %v2607_v28  ;;  %2109 = vmatpush3.bf16.msra.mxu1 %v2660_v37 }
 0x246   :  { %731 = vmatprep.subr.bf16.mxu0 %v2613_v29  ;;  %2110 = vmatprep.subr.bf16.mxu1 %v3500_v56 }
 0x249   :  { %732 = vmatpush1.bf16.msra.mxu0 %v2625_v31  ;;  %2111 = vmatpush3.bf16.msra.mxu1 %v2676_v39 }
 0x24a   :  { %733 = vmatprep.subr.bf16.mxu0 %v2633_v33  ;;  %2112 = vmatprep.subr.bf16.mxu1 %v3500_v56 }
 0x24d   :  { %734 = vmatpush1.bf16.msra.mxu0 %v2645_v35  ;;  %2113 = vmatpush3.bf16.msra.mxu1 %v2687_v40 }
 0x24e   :  { %735 = vmatprep.subr.bf16.mxu0 %v2653_v36  ;;  %2114 = vmatprep.subr.bf16.mxu1 %v3500_v56 }
 0x251   :  { %736 = vmatpush1.bf16.msra.mxu0 %v2666_v38  ;;  %2115 = vmatpush3.bf16.msra.mxu1 %v2698_v41 }
 0x252   :  { %824 = vmatprep.subr.bf16.mxu0 %v2513_v7  ;;  %2120 = vmatprep.subr.bf16.mxu1 %v3500_v56 }
 0x307   :  { %v652_v12 = vpop.f32.mrb[24].mxu0  ;;  %v693_v45 = vpop.f32.mrb[16].mxu1 }
 0x308   :  { %v699_v16 = vadd.f32 %v652_v12, %v2756_v58  ;;  %v654_v44 = vpop.f32.mrb[25].mxu0  ;;  %v2098_v46 = vpop.f32.mrb[17].mxu1  ;;  %v713_v22 = vadd.f32 %v693_v45, %v2804_v47 }
 0x309   :  { %v700_v48 = vadd.f32 %v654_v44, %v2758_v60  ;;  %v656_v21 = vpop.f32.mrb[26].mxu0  ;;  %v696_v43 = vpop.f32.mrb[18].mxu1 }
 0x30a   :  { %v1897_v49 = vmul.f32 -1.442695, %v699_v16  ;;  %v657_v50 = vpop.f32.mrb[27].mxu0  ;;  %v2099_v1 = vpop.f32.mrb[19].mxu1 }
 0x30b   :  { %v1898_v54 = vmul.f32 -1.442695, %v700_v48 }
 0x30c   :  { %2318 = vpow2.f32 %v1897_v49 }
 0x30d   :  { %2320 = vpow2.f32 %v1898_v54 }
 0x316   :  { %v2319_v42 = vpop.eup %2318 }
 0x317   :  { %v707_v52 = vadd.f32 1.0, %v2319_v42  ;;  %v2321_v59 = vpop.eup %2320 }
 0x318   :  { %v708_v57 = vadd.f32 1.0, %v2321_v59 }
 0x319   :  { %2322 = vrcp.f32 %v707_v52 }
 0x323   :  { %v2323_v55 = vpop.eup %2322 }
 0x324   :  { %v714_v58 = vmul.f32 %v2323_v55, %v713_v22 }
 0x326   :  { %v715_v25 = vadd.f32 %v714_v58, %v2763_v2 }
 0x328   :  { %2324 = vtanh.f32 %v715_v25 }
 0x329   :  { %2326 = vrcp.f32 %v708_v57 }
 0x332   :  { %v2325_v60 = vpop.eup %2324 }
 0x333   :  { %v717_v61 = vsub.f32 %v2852_v0, %v2325_v60  ;;  %v2327_v10 = vpop.eup %2326 }
 0x335   :  { %v718_v12 = vmul.f32 %v2327_v10, %v717_v61 }
 0x337   :  { %v2896_v16 = vadd.f32 %v2325_v60, %v718_v12 }
 0x339   :  { %v720_v44 = vpack.c.bf16 %v2896_v16, %v2896_v16 }
 0x33b   :  { %754 = vmatmul.mubr.bf16.vlgmr.msra.gmra.mrb[28].mxu0 %v720_v44  ;;  %2117 = vmatmul.mubr.bf16.vlgmr.msra.gmra.mrb[20].mxu1 %v720_v44 }
 0x33c   :  { %825 = vmatpush1.bf16.msra.mxu0 %v2518_v8  ;;  %2121 = vmatpush3.bf16.msra.mxu1 %v2580_v23 }
 0x33d   :  { %826 = vmatprep.subr.bf16.mxu0 %v2524_v9  ;;  %2122 = vmatprep.subr.bf16.mxu1 %v3500_v56 }
 0x33e   :  { %856 = vmatprep.mubr.bf16.mxu0 %v3501_v3  ;;  %2136 = vmatprep.mubr.msk.bf16.mxu1 %vm2476_vm1, %v3500_v56 }
 0x340   :  { %827 = vmatpush1.bf16.msra.mxu0 %v2535_v11  ;;  %2123 = vmatpush3.bf16.msra.mxu1 %v2596_v26 }
 0x341   :  { %828 = vmatprep.subr.bf16.mxu0 %v2545_v13  ;;  %2124 = vmatprep.subr.bf16.mxu1 %v3500_v56 }
 0x344   :  { %829 = vmatpush1.bf16.msra.mxu0 %v2557_v17  ;;  %2125 = vmatpush3.bf16.msra.mxu1 %v2619_v30 }
 0x345   :  { %830 = vmatprep.subr.bf16.mxu0 %v2563_v18  ;;  %2126 = vmatprep.subr.bf16.mxu1 %v3500_v56 }
 0x348   :  { %831 = vmatpush1.bf16.msra.mxu0 %v2572_v20  ;;  %2127 = vmatpush3.bf16.msra.mxu1 %v2639_v34 }
 0x349   :  { %832 = vmatprep.subr.bf16.mxu0 %v2586_v24  ;;  %2128 = vmatprep.subr.bf16.mxu1 %v3500_v56 }
 0x34c   :  { %833 = vmatpush1.bf16.msra.mxu0 %v2607_v28  ;;  %2129 = vmatpush3.bf16.msra.mxu1 %v2660_v37 }
 0x34d   :  { %834 = vmatprep.subr.bf16.mxu0 %v2613_v29  ;;  %2130 = vmatprep.subr.bf16.mxu1 %v3500_v56 }
 0x350   :  { %835 = vmatpush1.bf16.msra.mxu0 %v2625_v31  ;;  %2131 = vmatpush3.bf16.msra.mxu1 %v2676_v39 }
 0x351   :  { %836 = vmatprep.subr.bf16.mxu0 %v2633_v33  ;;  %2132 = vmatprep.subr.bf16.mxu1 %v3500_v56 }
 0x354   :  { %837 = vmatpush1.bf16.msra.mxu0 %v2645_v35  ;;  %2133 = vmatpush3.bf16.msra.mxu1 %v2687_v40 }
 0x355   :  { %838 = vmatprep.subr.bf16.mxu0 %v2653_v36  ;;  %2134 = vmatprep.subr.bf16.mxu1 %v3500_v56 }
 0x358   :  { %839 = vmatpush1.bf16.msra.mxu0 %v2666_v38  ;;  %2135 = vmatpush3.bf16.msra.mxu1 %v2698_v41 }
 0x359   :  { %927 = vmatprep.subr.bf16.mxu0 %v2513_v7  ;;  %2140 = vmatprep.subr.bf16.mxu1 %v3500_v56 }
 0x40e   :  { %v755_v2 = vpop.f32.mrb[28].mxu0  ;;  %v796_v45 = vpop.f32.mrb[20].mxu1 }
 0x40f   :  { %v802_v46 = vadd.f32 %v755_v2, %v2760_v63  ;;  %v757_v48 = vpop.f32.mrb[29].mxu0  ;;  %v2118_v21 = vpop.f32.mrb[21].mxu1  ;;  %v816_v55 = vadd.f32 %v796_v45, %v2804_v47 }
 0x410   :  { %v803_v43 = vadd.f32 %v757_v48, %v2765_v4  ;;  %v759_v49 = vpop.f32.mrb[30].mxu0  ;;  %v799_v50 = vpop.f32.mrb[22].mxu1 }
 0x411   :  { %v1899_v1 = vmul.f32 -1.442695, %v802_v46  ;;  %v760_v54 = vpop.f32.mrb[31].mxu0  ;;  %v2119_v42 = vpop.f32.mrb[23].mxu1 }
 0x412   :  { %v1900_v52 = vmul.f32 -1.442695, %v803_v43 }
 0x413   :  { %2328 = vpow2.f32 %v1899_v1 }
 0x414   :  { %2330 = vpow2.f32 %v1900_v52 }
 0x41d   :  { %v2329_v59 = vpop.eup %2328 }
 0x41e   :  { %v810_v22 = vadd.f32 1.0, %v2329_v59  ;;  %v2331_v7 = vpop.eup %2330 }
 0x41f   :  { %v811_v57 = vadd.f32 1.0, %v2331_v7 }
 0x420   :  { %2332 = vrcp.f32 %v810_v22 }
 0x42a   :  { %v2333_v58 = vpop.eup %2332 }
 0x42b   :  { %v817_v63 = vmul.f32 %v2333_v58, %v816_v55  ;;  %v2996_v58 = vld [vmem:[%s3482_s1 + $0x18] ss:$12 sps:$4 sm:$0xff]  }
 0x42d   :  { %v818_v25 = vadd.f32 %v817_v63, %v2768_v6  ;;  %v3013_v63 = vld [vmem:[%s3482_s1 + $0x30] ss:$12 sps:$4 sm:$0xff]  }
 0x42f   :  { %2334 = vtanh.f32 %v818_v25  ;;  %v3027_v25 = vld [vmem:[%s3482_s1 + $0x48] ss:$12 sps:$4 sm:$0xff]  }
 0x430   :  { %2336 = vrcp.f32 %v811_v57  ;;  %v3041_v57 = vld [vmem:[%s3482_s1 + $0x60] ss:$12 sps:$4 sm:$0xff]  }
 0x439   :  { %v2335_v4 = vpop.eup %2334 }
 0x43a   :  { %v820_v60 = vsub.f32 %v2896_v16, %v2335_v4  ;;  %v2337_v61 = vpop.eup %2336 }
 0x43c   :  { %v821_v10 = vmul.f32 %v2337_v61, %v820_v60 }
 0x43e   :  { %v2940_v12 = vadd.f32 %v2335_v4, %v821_v10 }
 0x440   :  { %v823_v44 = vpack.c.bf16 %v2940_v12, %v2940_v12 }
 0x442   :  { %857 = vmatmul.mubr.bf16.vlgmr.msra.gmra.mrb[32].mxu0 %v823_v44  ;;  %2137 = vmatmul.mubr.bf16.vlgmr.msra.gmra.mrb[24].mxu1 %v823_v44 }
 0x443   :  { %928 = vmatpush1.bf16.msra.mxu0 %v2518_v8  ;;  %2141 = vmatpush3.bf16.msra.mxu1 %v2580_v23  ;;  %v2980_v8 = vld [vmem:[%s3482_s1 + $0x1c] ss:$12 sps:$4 sm:$0xff]  }
 0x444   :  { %929 = vmatprep.subr.bf16.mxu0 %v2524_v9  ;;  %2142 = vmatprep.subr.bf16.mxu1 %v3500_v56 }
 0x445   :  { %959 = vmatprep.mubr.bf16.mxu0 %v3501_v3  ;;  %2156 = vmatprep.mubr.msk.bf16.mxu1 %vm2476_vm1, %v3500_v56 }
 0x447   :  { %930 = vmatpush1.bf16.msra.mxu0 %v2535_v11  ;;  %2143 = vmatpush3.bf16.msra.mxu1 %v2596_v26 }
 0x448   :  { %931 = vmatprep.subr.bf16.mxu0 %v2545_v13  ;;  %2144 = vmatprep.subr.bf16.mxu1 %v3500_v56 }
 0x44b   :  { %932 = vmatpush1.bf16.msra.mxu0 %v2557_v17  ;;  %2145 = vmatpush3.bf16.msra.mxu1 %v2619_v30 }
 0x44c   :  { %933 = vmatprep.subr.bf16.mxu0 %v2563_v18  ;;  %2146 = vmatprep.subr.bf16.mxu1 %v3500_v56 }
 0x44f   :  { %934 = vmatpush1.bf16.msra.mxu0 %v2572_v20  ;;  %2147 = vmatpush3.bf16.msra.mxu1 %v2639_v34 }
 0x450   :  { %935 = vmatprep.subr.bf16.mxu0 %v2586_v24  ;;  %2148 = vmatprep.subr.bf16.mxu1 %v3500_v56 }
 0x453   :  { %936 = vmatpush1.bf16.msra.mxu0 %v2607_v28  ;;  %2149 = vmatpush3.bf16.msra.mxu1 %v2660_v37 }
 0x454   :  { %937 = vmatprep.subr.bf16.mxu0 %v2613_v29  ;;  %2150 = vmatprep.subr.bf16.mxu1 %v3500_v56 }
 0x457   :  { %938 = vmatpush1.bf16.msra.mxu0 %v2625_v31  ;;  %2151 = vmatpush3.bf16.msra.mxu1 %v2676_v39 }
 0x458   :  { %939 = vmatprep.subr.bf16.mxu0 %v2633_v33  ;;  %2152 = vmatprep.subr.bf16.mxu1 %v3500_v56 }
 0x45b   :  { %940 = vmatpush1.bf16.msra.mxu0 %v2645_v35  ;;  %2153 = vmatpush3.bf16.msra.mxu1 %v2687_v40 }
 0x45c   :  { %941 = vmatprep.subr.bf16.mxu0 %v2653_v36  ;;  %2154 = vmatprep.subr.bf16.mxu1 %v3500_v56 }
 0x45f   :  { %942 = vmatpush1.bf16.msra.mxu0 %v2666_v38  ;;  %2155 = vmatpush3.bf16.msra.mxu1 %v2698_v41 }
 0x460   :  { %1030 = vmatprep.subr.bf16.mxu0 %v2980_v8  ;;  %2160 = vmatprep.subr.bf16.mxu1 %v3500_v56 }
 0x515   :  { %v858_v9 = vpop.f32.mrb[32].mxu0  ;;  %v899_v11 = vpop.f32.mrb[24].mxu1 }
 0x516   :  { %v905_v13 = vadd.f32 %v858_v9, %v2773_v15  ;;  %v860_v17 = vpop.f32.mrb[33].mxu0  ;;  %v2138_v18 = vpop.f32.mrb[25].mxu1  ;;  %v919_v50 = vadd.f32 %v899_v11, %v2804_v47 }
 0x517   :  { %v906_v20 = vadd.f32 %v860_v17, %v2775_v19  ;;  %v862_v24 = vpop.f32.mrb[34].mxu0  ;;  %v902_v6 = vpop.f32.mrb[26].mxu1 }
 0x518   :  { %v1901_v2 = vmul.f32 -1.442695, %v905_v13  ;;  %v863_v45 = vpop.f32.mrb[35].mxu0  ;;  %v2139_v46 = vpop.f32.mrb[27].mxu1 }
 0x519   :  { %v1902_v48 = vmul.f32 -1.442695, %v906_v20  ;;  %v2454_v45 = vld [vmem:[%s3482_s1 + $0x38] ss:$12 sps:$4 sm:$0xff]   ;;  %v2455_v46 = vld [vmem:[%s3482_s1 + $0x50] ss:$12 sps:$4 sm:$0xff]  }
 0x51a   :  { %2338 = vpow2.f32 %v1901_v2 }
 0x51b   :  { %2340 = vpow2.f32 %v1902_v48  ;;  %v2456_v48 = vld [vmem:[%s3482_s1 + $0x68] ss:$12 sps:$4 sm:$0xff]  }
 0x524   :  { %v2339_v21 = vpop.eup %2338 }
 0x525   :  { %v913_v43 = vadd.f32 1.0, %v2339_v21  ;;  %v2341_v49 = vpop.eup %2340  ;;  %v2457_v21 = vld [vmem:[%s3482_s1 + $0x78] ss:$12 sps:$4 sm:$0xff]  }
 0x526   :  { %v914_v42 = vadd.f32 1.0, %v2341_v49  ;;  %v2459_v49 = vld [vmem:[%s3482_s1 + $0x94] ss:$12 sps:$4 sm:$0xff]  }
 0x527   :  { %2342 = vrcp.f32 %v913_v43  ;;  %v2458_v43 = vld [vmem:[%s3482_s1 + $0x80] ss:$12 sps:$4 sm:$0xff]  }
 0x531   :  { %v2343_v1 = vpop.eup %2342 }
 0x532   :  { %v920_v15 = vmul.f32 %v2343_v1, %v919_v50  ;;  %v2460_v50 = vld [vmem:[%s3482_s1 + $0x90] ss:$12 sps:$4 sm:$0xff]   ;;  %v2461_v1 = vld [vmem:[%s3482_s1 + $0xac] ss:$12 sps:$4 sm:$0xff]  }
 0x534   :  { %v921_v54 = vadd.f32 %v920_v15, %v2785_v53  ;;  %v3003_v53 = vld [vmem:[%s3482_s1 + $0x34] ss:$12 sps:$4 sm:$0xff]  }
 0x535   :  { %v2462_v15 = vld [vmem:[%s3482_s1 + $0xa8] ss:$12 sps:$4 sm:$0xff]  }
 0x536   :  { %2344 = vtanh.f32 %v921_v54  ;;  %v2463_v54 = vld [vmem:[%s3482_s1 + $0xc4] ss:$12 sps:$4 sm:$0xff]  }
 0x537   :  { %2346 = vrcp.f32 %v914_v42 }
 0x540   :  { %v2345_v19 = vpop.eup %2344 }
 0x541   :  { %v923_v52 = vsub.f32 %v2940_v12, %v2345_v19  ;;  %v2347_v59 = vpop.eup %2346 }
 0x543   :  { %v924_v22 = vmul.f32 %v2347_v59, %v923_v52 }
 0x545   :  { %v2989_v7 = vadd.f32 %v2345_v19, %v924_v22  ;;  %v3502_v22 = vld [vmem:[#allocation5_spill] sm:$0xff] }
 0x547   :  { %v926_v55 = vpack.c.bf16 %v2989_v7, %v2989_v7 }
 0x549   :  { %960 = vmatmul.mubr.bf16.vlgmr.msra.gmra.mrb[36].mxu0 %v926_v55  ;;  %2157 = vmatmul.mubr.bf16.vlgmr.msra.gmra.mrb[28].mxu1 %v926_v55 }
 0x54a   :  { %1031 = vmatpush1.bf16.msra.mxu0 %v2996_v58  ;;  %2161 = vmatpush3.bf16.msra.mxu1 %v2580_v23  ;;  %v3020_v23 = vld [vmem:[%s3482_s1 + $0x4c] ss:$12 sps:$4 sm:$0xff]  }
 0x54b   :  { %1032 = vmatprep.subr.bf16.mxu0 %v3003_v53  ;;  %2162 = vmatprep.subr.bf16.mxu1 %v3500_v56 }
 0x54c   :  { %1062 = vmatprep.mubr.bf16.mxu0 %v3501_v3  ;;  %2176 = vmatprep.mubr.msk.bf16.mxu1 %vm2476_vm1, %v3500_v56 }
 0x54e   :  { %1033 = vmatpush1.bf16.msra.mxu0 %v3013_v63  ;;  %2163 = vmatpush3.bf16.msra.mxu1 %v2596_v26  ;;  %v3034_v26 = vld [vmem:[%s3482_s1 + $0x64] ss:$12 sps:$4 sm:$0xff]  }
 0x54f   :  { %1034 = vmatprep.subr.bf16.mxu0 %v3020_v23  ;;  %2164 = vmatprep.subr.bf16.mxu1 %v3500_v56 }
 0x552   :  { %1035 = vmatpush1.bf16.msra.mxu0 %v3027_v25  ;;  %2165 = vmatpush3.bf16.msra.mxu1 %v2619_v30  ;;  %v3048_v30 = vld [vmem:[%s3482_s1 + $0x7c] ss:$12 sps:$4 sm:$0xff]  }
 0x553   :  { %1036 = vmatprep.subr.bf16.mxu0 %v3034_v26  ;;  %2166 = vmatprep.subr.bf16.mxu1 %v3500_v56 }
 0x556   :  { %1037 = vmatpush1.bf16.msra.mxu0 %v3041_v57  ;;  %2167 = vmatpush3.bf16.msra.mxu1 %v2639_v34 }
 0x557   :  { %1038 = vmatprep.subr.bf16.mxu0 %v3048_v30  ;;  %2168 = vmatprep.subr.bf16.mxu1 %v3500_v56 }
 0x55a   :  { %1039 = vmatpush1.bf16.msra.mxu0 %v2607_v28  ;;  %2169 = vmatpush3.bf16.msra.mxu1 %v2660_v37 }
 0x55b   :  { %1040 = vmatprep.subr.bf16.mxu0 %v2613_v29  ;;  %2170 = vmatprep.subr.bf16.mxu1 %v3500_v56 }
 0x55e   :  { %1041 = vmatpush1.bf16.msra.mxu0 %v2625_v31  ;;  %2171 = vmatpush3.bf16.msra.mxu1 %v2676_v39 }
 0x55f   :  { %1042 = vmatprep.subr.bf16.mxu0 %v2633_v33  ;;  %2172 = vmatprep.subr.bf16.mxu1 %v3500_v56 }
 0x562   :  { %1043 = vmatpush1.bf16.msra.mxu0 %v2645_v35  ;;  %2173 = vmatpush3.bf16.msra.mxu1 %v2687_v40 }
 0x563   :  { %1044 = vmatprep.subr.bf16.mxu0 %v2653_v36  ;;  %2174 = vmatprep.subr.bf16.mxu1 %v3500_v56 }
 0x566   :  { %1045 = vmatpush1.bf16.msra.mxu0 %v2666_v38  ;;  %2175 = vmatpush3.bf16.msra.mxu1 %v2698_v41 }
 0x567   :  { %1133 = vmatprep.subr.bf16.mxu0 %v2980_v8  ;;  %2180 = vmatprep.subr.bf16.mxu1 %v3500_v56 }
 0x61c   :  { %v961_v28 = vpop.f32.mrb[36].mxu0  ;;  %v1002_v29 = vpop.f32.mrb[28].mxu1 }
 0x61d   :  { %v1008_v31 = vadd.f32 %v961_v28, %v2777_v27  ;;  %v963_v33 = vpop.f32.mrb[37].mxu0  ;;  %v2158_v34 = vpop.f32.mrb[29].mxu1  ;;  %v1022_v9 = vadd.f32 %v1002_v29, %v2804_v47  ;;  %v3503_v29 = vld [vmem:[#allocation3_spill] sm:$0xff] }
 0x61e   :  { %v1009_v35 = vadd.f32 %v963_v33, %v2782_v51  ;;  %v965_v37 = vpop.f32.mrb[38].mxu0  ;;  %v1005_v36 = vpop.f32.mrb[30].mxu1 }
 0x61f   :  { %v1903_v4 = vmul.f32 -1.442695, %v1008_v31  ;;  %v966_v60 = vpop.f32.mrb[39].mxu0  ;;  %v2159_v61 = vpop.f32.mrb[31].mxu1 }
 0x620   :  { %v1904_v38 = vmul.f32 -1.442695, %v1009_v35  ;;  %v2268_v61 = vld [vmem:[%s3482_s1 + $0xdc] ss:$12 sps:$4 sm:$0xff]  }
 0x621   :  { %2348 = vpow2.f32 %v1903_v4 }
 0x622   :  { %2350 = vpow2.f32 %v1904_v38  ;;  %v2266_v38 = vld [vmem:[%s3482_s1 + $0xd8] ss:$12 sps:$4 sm:$0xff]  }
 0x62b   :  { %v2349_v10 = vpop.eup %2348 }
 0x62c   :  { %v1016_v44 = vadd.f32 1.0, %v2349_v10  ;;  %v2351_v8 = vpop.eup %2350  ;;  %v2269_v10 = vld [vmem:[%s3482_s1 + $0xe0] ss:$12 sps:$4 sm:$0xff]  }
 0x62d   :  { %v1017_v17 = vadd.f32 1.0, %v2351_v8  ;;  %v2270_v8 = vld [vmem:[%s3482_s1 + $0xf0] ss:$12 sps:$4 sm:$0xff]  }
 0x62e   :  { %2352 = vrcp.f32 %v1016_v44  ;;  %v2272_v44 = vld [vmem:[%s3482_s1 + $0xf4] ss:$12 sps:$4 sm:$0xff]  }
 0x638   :  { %v2353_v11 = vpop.eup %2352 }
 0x639   :  { %v1023_v27 = vmul.f32 %v2353_v11, %v1022_v9  ;;  %v2273_v9 = vld [vmem:[%s3482_s1 + $0xf8] ss:$12 sps:$4 sm:$0xff]  }
 0x63a   :  { %v2276_v11 = vld [vmem:[%s3482_s1 + $0x10c] ss:$12 sps:$4 sm:$0xff]  }
 0x63b   :  { %v1024_v13 = vadd.f32 %v1023_v27, %v2791_v62  ;;  %v2453_v62 = vld [vmem:[%s3482_s1 + $0x20] ss:$12 sps:$4 sm:$0xff]   ;;  %v2274_v27 = vld [vmem:[%s3482_s1 + $0x108] ss:$12 sps:$4 sm:$0xff]  }
 0x63d   :  { %2354 = vtanh.f32 %v1024_v13  ;;  %v2277_v13 = vld [vmem:[%s3482_s1 + $0x110] ss:$12 sps:$4 sm:$0xff]  }
 0x63e   :  { %2356 = vrcp.f32 %v1017_v17  ;;  %v2280_v17 = vld [vmem:[%s3482_s1 + $0x124] ss:$12 sps:$4 sm:$0xff]  }
 0x647   :  { %v2355_v51 = vpop.eup %2354 }
 0x648   :  { %v1026_v18 = vsub.f32 %v2989_v7, %v2355_v51  ;;  %v2357_v20 = vpop.eup %2356 }
 0x64a   :  { %v1027_v24 = vmul.f32 %v2357_v20, %v1026_v18  ;;  %v2281_v18 = vld [vmem:[%s3482_s1 + $0x128] ss:$12 sps:$4 sm:$0xff]  }
 0x64b   :  { %v2284_v20 = vld [vmem:[%s3482_s1 + $0x13c] ss:$12 sps:$4 sm:$0xff]  }
 0x64c   :  { %v3073_v6 = vadd.f32 %v2355_v51, %v1027_v24  ;;  %v2278_v51 = vld [vmem:[%s3482_s1 + $0x120] ss:$12 sps:$4 sm:$0xff]   ;;  %v2282_v24 = vld [vmem:[%s3482_s1 + $0x138] ss:$12 sps:$4 sm:$0xff]  }
 0x64e   :  { %v1029_v2 = vpack.c.bf16 %v3073_v6, %v3073_v6 }
 0x650   :  { %1063 = vmatmul.mubr.bf16.vlgmr.msra.gmra.mrb[40].mxu0 %v1029_v2  ;;  %2177 = vmatmul.mubr.bf16.vlgmr.msra.gmra.mrb[32].mxu1 %v1029_v2  ;;  %v2285_v2 = vld [vmem:[%s3482_s1 + $0x140] ss:$12 sps:$4 sm:$0xff]  }
 0x651   :  { %1134 = vmatpush1.bf16.msra.mxu0 %v2996_v58  ;;  %2181 = vmatpush3.bf16.msra.mxu1 %v2453_v62  ;;  %v2288_v62 = vld [vmem:[%s3482_s1 + $0x154] ss:$12 sps:$4 sm:$0xff]  }
 0x652   :  { %1135 = vmatprep.subr.bf16.mxu0 %v3003_v53  ;;  %2182 = vmatprep.subr.bf16.mxu1 %v3500_v56 }
 0x653   :  { %1165 = vmatprep.mubr.bf16.mxu0 %v3501_v3  ;;  %2196 = vmatprep.mubr.msk.bf16.mxu1 %vm2476_vm1, %v3500_v56 }
 0x655   :  { %1136 = vmatpush1.bf16.msra.mxu0 %v3013_v63  ;;  %2183 = vmatpush3.bf16.msra.mxu1 %v2454_v45  ;;  %v2286_v45 = vld [vmem:[%s3482_s1 + $0x150] ss:$12 sps:$4 sm:$0xff]  }
 0x656   :  { %1137 = vmatprep.subr.bf16.mxu0 %v3020_v23  ;;  %2184 = vmatprep.subr.bf16.mxu1 %v3500_v56 }
 0x659   :  { %1138 = vmatpush1.bf16.msra.mxu0 %v3027_v25  ;;  %2185 = vmatpush3.bf16.msra.mxu1 %v2455_v46  ;;  %v2289_v46 = vld [vmem:[%s3482_s1 + $0x158] ss:$12 sps:$4 sm:$0xff]  }
 0x65a   :  { %1139 = vmatprep.subr.bf16.mxu0 %v3034_v26  ;;  %2186 = vmatprep.subr.bf16.mxu1 %v3500_v56 }
 0x65d   :  { %1140 = vmatpush1.bf16.msra.mxu0 %v3041_v57  ;;  %2187 = vmatpush3.bf16.msra.mxu1 %v2456_v48  ;;  %v2292_v48 = vld [vmem:[%s3482_s1 + $0x16c] ss:$12 sps:$4 sm:$0xff]  }
 0x65e   :  { %1141 = vmatprep.subr.bf16.mxu0 %v3048_v30  ;;  %2188 = vmatprep.subr.bf16.mxu1 %v3500_v56 }
 0x661   :  { %1142 = vmatpush1.bf16.msra.mxu0 %v2457_v21  ;;  %2189 = vmatpush3.bf16.msra.mxu1 %v2458_v43  ;;  %v2290_v21 = vld [vmem:[%s3482_s1 + $0x168] ss:$12 sps:$4 sm:$0xff]   ;;  %v2293_v43 = vld [vmem:[%s3482_s1 + $0x170] ss:$12 sps:$4 sm:$0xff]  }
 0x662   :  { %1143 = vmatprep.subr.bf16.mxu0 %v2459_v49  ;;  %2190 = vmatprep.subr.bf16.mxu1 %v3500_v56  ;;  %v2294_v49 = vld [vmem:[%s3482_s1 + $0x180] ss:$12 sps:$4 sm:$0xff]  }
 0x665   :  { %1144 = vmatpush1.bf16.msra.mxu0 %v2460_v50  ;;  %2191 = vmatpush3.bf16.msra.mxu1 %v2676_v39  ;;  %v2464_v39 = vld [vmem:[%s3482_s1 + $0xc0] ss:$12 sps:$4 sm:$0xff]   ;;  %v2296_v50 = vld [vmem:[%s3482_s1 + $0x184] ss:$12 sps:$4 sm:$0xff]  }
 0x666   :  { %1145 = vmatprep.subr.bf16.mxu0 %v2461_v1  ;;  %2192 = vmatprep.subr.bf16.mxu1 %v3500_v56  ;;  %v2297_v1 = vld [vmem:[%s3482_s1 + $0x188] ss:$12 sps:$4 sm:$0xff]  }
 0x669   :  { %1146 = vmatpush1.bf16.msra.mxu0 %v2462_v15  ;;  %2193 = vmatpush3.bf16.msra.mxu1 %v2687_v40 }
 0x66a   :  { %1147 = vmatprep.subr.bf16.mxu0 %v2463_v54  ;;  %2194 = vmatprep.subr.bf16.mxu1 %v3500_v56 }
 0x66d   :  { %1148 = vmatpush1.bf16.msra.mxu0 %v2464_v39  ;;  %2195 = vmatpush3.bf16.msra.mxu1 %v2698_v41  ;;  %v3504_v39 = vld [vmem:[#allocation6_spill] sm:$0xff] }
 0x66e   :  { %1490 = vmatprep.subr.bf16.mxu0 %v2268_v61  ;;  %2200 = vmatprep.subr.bf16.mxu1 %v2269_v10 }
 0x723   :  { %v1064_v42 = vpop.f32.mrb[40].mxu0  ;;  %v1105_v19 = vpop.f32.mrb[32].mxu1 }
 0x724   :  { %v1111_v52 = vadd.f32 %v1064_v42, %v2793_v5  ;;  %v1066_v59 = vpop.f32.mrb[41].mxu0  ;;  %v2178_v40 = vpop.f32.mrb[33].mxu1  ;;  %v1125_v30 = vadd.f32 %v1105_v19, %v2804_v47 }
 0x725   :  { %v1112_v55 = vadd.f32 %v1066_v59, %v3502_v22  ;;  %v1068_v58 = vpop.f32.mrb[42].mxu0  ;;  %v1108_v53 = vpop.f32.mrb[34].mxu1 }
 0x726   :  { %v1905_v63 = vmul.f32 -1.442695, %v1111_v52  ;;  %v1069_v23 = vpop.f32.mrb[43].mxu0  ;;  %v2179_v56 = vpop.f32.mrb[35].mxu1 }
 0x727   :  { %v1906_v25 = vmul.f32 -1.442695, %v1112_v55 }
 0x728   :  { %2358 = vpow2.f32 %v1905_v63 }
 0x729   :  { %2360 = vpow2.f32 %v1906_v25  ;;  %v1238_v25 = vpop.permute.xlu0 %1237 }
 0x732   :  { %v2359_v26 = vpop.eup %2358 }
 0x733   :  { %v1119_v57 = vadd.f32 1.0, %v2359_v26  ;;  %v2361_v41 = vpop.eup %2360 }
 0x734   :  { %v1120_v33 = vadd.f32 1.0, %v2361_v41 }
 0x735   :  { %2362 = vrcp.f32 %v1119_v57 }
 0x73f   :  { %v2363_v28 = vpop.eup %2362 }
 0x740   :  { %v1126_v5 = vmul.f32 %v2363_v28, %v1125_v30  ;;  %v1243_v28 = vpop.permute.xlu0 %1242 }
 0x742   :  { %v1127_v31 = vadd.f32 %v1126_v5, %v3503_v29  ;;  %v1248_v5 = vpop.permute.xlu1 %1247 }
 0x744   :  { %2364 = vtanh.f32 %v1127_v31 }
 0x745   :  { %2366 = vrcp.f32 %v1120_v33  ;;  %v1276_v33 = vmul.f32 %v1243_v28, %v2852_v0 }
 0x74e   :  { %v2365_v34 = vpop.eup %2364 }
 0x74f   :  { %v1129_v35 = vsub.f32 %v3073_v6, %v2365_v34  ;;  %v2367_v37 = vpop.eup %2366 }
 0x751   :  { %v1130_v36 = vmul.f32 %v2367_v37, %v1129_v35  ;;  %v1277_v35 = vmul.f32 %v1248_v5, %v2896_v16  ;;  %v1253_v37 = vpop.permute.xlu1 %1252 }
 0x753   :  { %v3139_v4 = vadd.f32 %v2365_v34, %v1130_v36  ;;  %v1275_v34 = vmul.f32 %v1238_v25, %v2808_v14  ;;  %v1298_v36 = vmul.f32 %v1276_v33, %v2852_v0 }
 0x755   :  { %v1132_v60 = vpack.c.bf16 %v3139_v4, %v3139_v4  ;;  %v1297_v61 = vmul.f32 %v1275_v34, %v2808_v14 }
 0x757   :  { %1166 = vmatmul.mubr.bf16.vlgmr.msra.gmra.mrb[44].mxu0 %v1132_v60  ;;  %2197 = vmatmul.mubr.bf16.vlgmr.msra.gmra.mrb[36].mxu1 %v1132_v60  ;;  %v1258_v60 = vpop.permute.xlu0 %1257 }
 0x758   :  { %1522 = vmatprep.mubr.bf16.mxu0 %v3501_v3  ;;  %1491 = vmatpush1.bf16.msra.mxu0 %v2266_v38  ;;  %v1299_v38 = vmul.f32 %v1277_v35, %v2896_v16 }
 0x759   :  { %2201 = vmatpush3.bf16.msra.mxu1 %v2269_v10  ;;  %1492 = vmatprep.subr.bf16.mxu0 %v2272_v44  ;;  %v1263_v10 = vpop.permute.xlu1 %1262  ;;  %v1283_v44 = vadd.f32 %v1276_v33, %v1275_v34  ;;  %v86_v34 = vld [vmem:[%s3484_s2 + $0x2] ss:$0 sm:$0xff] }
 0x75a   :  { %2202 = vmatprep.subr.bf16.mxu1 %v2273_v9 }
 0x75c   :  { %1493 = vmatpush1.bf16.msra.mxu0 %v2270_v8  ;;  %v1279_v8 = vmul.f32 %v1258_v60, %v2989_v7 }
 0x75d   :  { %2203 = vmatpush3.bf16.msra.mxu1 %v2273_v9  ;;  %1494 = vmatprep.subr.bf16.mxu0 %v2276_v11  ;;  %v1305_v9 = vadd.f32 %v1298_v36, %v1297_v61  ;;  %v1268_v11 = vpop.permute.xlu0 %1267  ;;  %v87_v36 = vld [vmem:[%s3484_s2 + $0xa] ss:$0 sm:$0xff] }
 0x75e   :  { %2204 = vmatprep.subr.bf16.mxu1 %v2277_v13 }
 0x760   :  { %1495 = vmatpush1.bf16.msra.mxu0 %v2274_v27  ;;  %v1284_v27 = vadd.f32 %v1283_v44, %v1277_v35 }
 0x761   :  { %2205 = vmatpush3.bf16.msra.mxu1 %v2277_v13  ;;  %1496 = vmatprep.subr.bf16.mxu0 %v2280_v17  ;;  %v1280_v17 = vmul.f32 %v1263_v10, %v3073_v6 }
 0x762   :  { %2206 = vmatprep.subr.bf16.mxu1 %v2281_v18 }
 0x764   :  { %1497 = vmatpush1.bf16.msra.mxu0 %v2278_v51 }
 0x765   :  { %2207 = vmatpush3.bf16.msra.mxu1 %v2281_v18  ;;  %1498 = vmatprep.subr.bf16.mxu0 %v2284_v20  ;;  %v1306_v18 = vadd.f32 %v1305_v9, %v1299_v38 }
 0x766   :  { %2208 = vmatprep.subr.bf16.mxu1 %v2285_v2 }
 0x768   :  { %1499 = vmatpush1.bf16.msra.mxu0 %v2282_v24  ;;  %v1301_v24 = vmul.f32 %v1279_v8, %v2989_v7 }
 0x769   :  { %2209 = vmatpush3.bf16.msra.mxu1 %v2285_v2  ;;  %1500 = vmatprep.subr.bf16.mxu0 %v2288_v62  ;;  %v1281_v2 = vmul.f32 %v1268_v11, %v3139_v4 }
 0x76a   :  { %2210 = vmatprep.subr.bf16.mxu1 %v2289_v46 }
 0x76c   :  { %1501 = vmatpush1.bf16.msra.mxu0 %v2286_v45 }
 0x76d   :  { %2211 = vmatpush3.bf16.msra.mxu1 %v2289_v46  ;;  %1502 = vmatprep.subr.bf16.mxu0 %v2292_v48 }
 0x76e   :  { %2212 = vmatprep.subr.bf16.mxu1 %v2293_v43 }
 0x770   :  { %1503 = vmatpush1.bf16.msra.mxu0 %v2290_v21  ;;  %v1302_v21 = vmul.f32 %v1280_v17, %v3073_v6 }
 0x771   :  { %2213 = vmatpush3.bf16.msra.mxu1 %v2293_v43  ;;  %1504 = vmatprep.subr.bf16.mxu0 %v2296_v50 }
 0x772   :  { %2214 = vmatprep.subr.bf16.mxu1 %v2297_v1 }
 0x774   :  { %1505 = vmatpush1.bf16.msra.mxu0 %v2294_v49 }
 0x775   :  { %2215 = vmatpush3.bf16.msra.mxu1 %v2297_v1  ;;  %v1303_v1 = vmul.f32 %v1281_v2, %v3139_v4 }
 0x82a   :  { %v1167_v15 = vpop.f32.mrb[44].mxu0  ;;  %v1208_v54 = vpop.f32.mrb[36].mxu1 }
 0x82b   :  { %v1214_v42 = vadd.f32 %v1167_v15, %v3504_v39  ;;  %v1169_v19 = vpop.f32.mrb[45].mxu0  ;;  %v2198_v52 = vpop.f32.mrb[37].mxu1  ;;  %v1228_v57 = vadd.f32 %v1208_v54, %v2804_v47  ;;  %v1278_v47 = vmul.f32 %v1253_v37, %v2940_v12 }
 0x82c   :  { %v1215_v59 = vadd.f32 %v1169_v19, %v2799_v32  ;;  %v1171_v40 = vpop.f32.mrb[46].mxu0  ;;  %v1211_v22 = vpop.f32.mrb[38].mxu1  ;;  %v3505_v32 = vld [vmem:[#allocation4_spill] sm:$0xff] }
 0x82d   :  { %v1907_v55 = vmul.f32 -1.442695, %v1214_v42  ;;  %v1172_v58 = vpop.f32.mrb[47].mxu0  ;;  %v2199_v53 = vpop.f32.mrb[39].mxu1  ;;  %v1300_v13 = vmul.f32 %v1278_v47, %v2940_v12  ;;  %v1285_v20 = vadd.f32 %v1284_v27, %v1278_v47 }
 0x82e   :  { %v1908_v63 = vmul.f32 -1.442695, %v1215_v59  ;;  %v1273_v54 = vpop.permute.xlu1 %1272 }
 0x82f   :  { %2368 = vpow2.f32 %v1907_v55  ;;  %v1307_v46 = vadd.f32 %v1306_v18, %v1300_v13  ;;  %v1286_v48 = vadd.f32 %v1285_v20, %v1279_v8 }
 0x830   :  { %2370 = vpow2.f32 %v1908_v63 }
 0x831   :  { %v1308_v49 = vadd.f32 %v1307_v46, %v1301_v24  ;;  %v1287_v50 = vadd.f32 %v1286_v48, %v1280_v17 }
 0x833   :  { %v1309_v39 = vadd.f32 %v1308_v49, %v1302_v21  ;;  %v1288_v42 = vadd.f32 %v1287_v50, %v1281_v2  ;;  %v3254_v2 = vld [vmem:[%s3484_s2 + $0x1] ss:$8 sm:$0x7] }
 0x835   :  { %v1310_v52 = vadd.f32 %v1309_v39, %v1303_v1 }
 0x839   :  { %v2369_v23 = vpop.eup %2368 }
 0x83a   :  { %v1222_v56 = vadd.f32 1.0, %v2369_v23  ;;  %v2371_v26 = vpop.eup %2370 }
 0x83b   :  { %v1223_v31 = vadd.f32 1.0, %v2371_v26 }
 0x83c   :  { %2372 = vrcp.f32 %v1222_v56 }
 0x846   :  { %v2373_v41 = vpop.eup %2372 }
 0x847   :  { %v1229_v30 = vmul.f32 %v2373_v41, %v1228_v57 }
 0x849   :  { %v1230_v29 = vadd.f32 %v1229_v30, %v3505_v32 }
 0x84b   :  { %2374 = vtanh.f32 %v1230_v29 }
 0x84c   :  { %2376 = vrcp.f32 %v1223_v31 }
 0x855   :  { %v2375_v51 = vpop.eup %2374 }
 0x856   :  { %v1232_v62 = vsub.f32 %v3139_v4, %v2375_v51  ;;  %v2377_v45 = vpop.eup %2376 }
 0x858   :  { %v1233_v43 = vmul.f32 %v2377_v45, %v1232_v62  ;;  %v3506_v62 = vld [vmem:[#allocation2_spill] sm:$0xff] }
 0x859   :  { %v3508_v46 = vsub.s32 2, %v3506_v62 }
 0x85a   :  { %v1234_v15 = vadd.f32 %v2375_v51, %v1233_v43 }
 0x85b   :  { %v3264_v48 = vrot.slane %v3254_v2, %v3508_v46 }
 0x85c   :  { %v1282_v19 = vmul.f32 %v1273_v54, %v1234_v15 }
 0x85e   :  { %v1289_v59 = vadd.f32 %v1288_v42, %v1282_v19  ;;  %v1304_v40 = vmul.f32 %v1282_v19, %v1234_v15 }
 0x860   :  { %v1290_v22 = vrot.slane %v1289_v59, 4  ;;  %v1311_v55 = vadd.f32 %v1310_v52, %v1304_v40 }
 0x862   :  { %v1291_v58 = vadd.f32 %v1290_v22, %v1289_v59  ;;  %v1312_v53 = vrot.slane %v1311_v55, 4 }
 0x864   :  { %v1292_v63 = vrot.slane %v1291_v58, 2  ;;  %v1313_v23 = vadd.f32 %v1312_v53, %v1311_v55 }
 0x866   :  { %v1293_v56 = vadd.f32 %v1292_v63, %v1291_v58  ;;  %v1314_v25 = vrot.slane %v1313_v23, 2 }
 0x868   :  { %v1294_v26 = vrot.slane %v1293_v56, 1  ;;  %v1315_v57 = vadd.f32 %v1314_v25, %v1313_v23 }
 0x86a   :  { %v1295_v41 = vadd.f32 %v1294_v26, %v1293_v56  ;;  %v1316_v30 = vrot.slane %v1315_v57, 1 }
 0x86c   :  { %v1296_v28 = vmul.f32 0.0625, %v1295_v41  ;;  %v1317_v5 = vadd.f32 %v1316_v30, %v1315_v57 }
 0x86e   :  { %v1318_v32 = vmul.f32 0.0625, %v1317_v5  ;;  %v1319_v29 = vmul.f32 %v1296_v28, %v1296_v28 }
 0x870   :  { %v1320_v31 = vsub.f32 %v1318_v32, %v1319_v29 }
 0x872   :  { %v1321_v33 = vadd.f32 1e-05, %v1320_v31 }
 0x874   :  { %2378 = vrsqrt.f32 %v1321_v33 }
 0x87e   :  { %v2379_v35 = vpop.eup %2378 }
 0x87f   :  { %v1323_v37 = vmul.f32 %v2379_v35, %v86_v34 }
 0x881   :  { %v1324_v60 = vmul.f32 %v1323_v37, %v1296_v28  ;;  %v1326_v47 = vmul.f32 %v1323_v37, %v2808_v14  ;;  %v1327_v38 = vmul.f32 %v1323_v37, %v2852_v0  ;;  %v1328_v10 = vmul.f32 %v1323_v37, %v2896_v16 }
 0x882   :  { %v1329_v44 = vmul.f32 %v1323_v37, %v2940_v12  ;;  %v1330_v8 = vmul.f32 %v1323_v37, %v2989_v7  ;;  %v1331_v9 = vmul.f32 %v1323_v37, %v3073_v6  ;;  %v1332_v0 = vmul.f32 %v1323_v37, %v3139_v4 }
 0x883   :  { %v1325_v61 = vsub.f32 %v87_v36, %v1324_v60  ;;  %v1333_v16 = vmul.f32 %v1323_v37, %v1234_v15  ;;  %v3507_v4 = vsub.s32 1, %v3506_v62 }
 0x885   :  { %v1334_v11 = vadd.f32 %v1326_v47, %v1325_v61  ;;  %v1335_v27 = vadd.f32 %v1327_v38, %v1325_v61  ;;  %v1336_v13 = vadd.f32 %v1328_v10, %v1325_v61  ;;  %v1337_v17 = vadd.f32 %v1329_v44, %v1325_v61 }
 0x886   :  { %v1338_v51 = vadd.f32 %v1330_v8, %v1325_v61  ;;  %v1339_v18 = vadd.f32 %v1331_v9, %v1325_v61  ;;  %v1340_v12 = vadd.f32 %v1332_v0, %v1325_v61  ;;  %v1341_v7 = vadd.f32 %v1333_v16, %v1325_v61 }
 0x887   :  { %v1342_v20 = vpack.c.bf16 %v1335_v27, %v1334_v11  ;;  %v1343_v24 = vpack.c.bf16 %v1337_v17, %v1336_v13  ;;  %v3259_v45 = vrot.slane %v3254_v2, %v3507_v4 }
 0x888   :  { %v1344_v14 = vpack.c.bf16 %v1339_v18, %v1338_v51  ;;  %v1345_v6 = vpack.c.bf16 %v1341_v7, %v1340_v12  ;;  %v3509_v7 = vsub.s32 0, %v3506_v62 }
 0x889   :  { %1523 = vmatmul.mubr.bf16.vlgmr.msra.gmra.mrb[48].mxu0 %v1342_v20  ;;  %2216 = vmatprep.mubr.bf16.mxu1 %v1342_v20 }
 0x88a   :  { %2217 = vmatmul.mubr.bf16.vlgmr.msra.gmra.mrb[40].mxu1 %v1343_v24  ;;  %1532 = vmatprep.mubr.bf16.mxu0 %v3501_v3 }
 0x88b   :  { %2220 = vmatprep.mubr.bf16.mxu1 %v1344_v14 }
 0x891   :  { %1533 = vmatmul.mubr.bf16.gmra.mrb[52].mxu0 %v1343_v24 }
 0x892   :  { %2221 = vmatmul.mubr.bf16.gmra.mrb[44].mxu1 %v1345_v6  ;;  %1542 = vmatprep.mubr.bf16.mxu0 %v3501_v3 }
 0x899   :  { %1543 = vmatmul.mubr.bf16.gmra.mrb[56].mxu0 %v1344_v14 }
 0x89a   :  { %1552 = vmatprep.mubr.bf16.mxu0 %v3501_v3 }
 0x8a1   :  { %1553 = vmatmul.mubr.bf16.gmra.mrb[60].mxu0 %v1345_v6  ;;  %v3314_v6 = vrot.slane %v3254_v2, %v3509_v7 }
 0x95c   :  { %v3266_v21 = vpop.f32.mrb[48].mxu0 }
 0x95d   :  { %v1526_v43 = vpop.f32.mrb[49].mxu0  ;;  %v2218_v3 = vpop.f32.mrb[40].mxu1 }
 0x95e   :  { %v3269_v49 = vadd.f32 %v1526_v43, %v3259_v45  ;;  %v3271_v50 = vpop.f32.mrb[50].mxu0  ;;  %v1597_v1 = vpop.f32.mrb[41].mxu1  ;;  %v1606_v15 = vadd.f32 %v2218_v3, %v3264_v48 }
 0x95f   :  { %v1598_v54 = vadd.f32 %v1597_v1, %v3264_v48  ;;  %v1530_v39 = vpop.f32.mrb[51].mxu0  ;;  %v2219_v42 = vpop.f32.mrb[42].mxu1 }
 0x960   :  { %v1652_v19 = vand.u32 2147483647, %v3269_v49  ;;  %v1600_v52 = vpop.f32.mrb[43].mxu1  ;;  %v3277_v40 = vadd.f32 %v1530_v39, %v3259_v45  ;;  %v1935_v58 = vmul.f32 -1.442695, %v1606_v15  ;;  %v1609_v63 = vadd.f32 %v2219_v42, %v3264_v48 }
 0x961   :  { %v1933_v59 = vmul.f32 -1.442695, %v1598_v54  ;;  %v1601_v22 = vadd.f32 %v1600_v52, %v3264_v48  ;;  %v3328_v52 = vadd.f32 %v3266_v21, %v3314_v6  ;;  %vm1636_vm2 = vcmp.ne.f32.partialorder %v3269_v49, %v3269_v49 }
 0x962   :  { %v1660_v55 = vsub.f32 0.0, %v1652_v19  ;;  %v1653_v53 = vand.u32 2147483647, %v3277_v40  ;;  %v1936_v5 = vmul.f32 -1.442695, %v1609_v63  ;;  %v1628_v63 = vmax.f32 %v3269_v49, 0.0 }
 0x963   :  { %2380 = vpow2.f32 %v1933_v59  ;;  %v1934_v56 = vmul.f32 -1.442695, %v1601_v22  ;;  %vm1637_vm5 = vcmp.ne.f32.partialorder %v3277_v40, %v3277_v40 }
 0x964   :  { %v1668_v23 = vmul.f32 1.442695, %v1660_v55  ;;  %v1661_v25 = vsub.f32 0.0, %v1653_v53  ;;  %v3282_v26 = vpop.f32.mrb[52].mxu0 }
 0x965   :  { %v2222_v57 = vpop.f32.mrb[44].mxu1  ;;  %v1536_v41 = vpop.f32.mrb[53].mxu0 }
 0x966   :  { %2382 = vpow2.f32 %v1668_v23  ;;  %v1613_v30 = vpop.f32.mrb[45].mxu1  ;;  %v1670_v28 = vmul.f32 1.442695, %v1661_v25  ;;  %v3285_v32 = vadd.f32 %v1536_v41, %v3259_v45  ;;  %v3287_v29 = vpop.f32.mrb[54].mxu0  ;;  %v1622_v14 = vadd.f32 %v2222_v57, %v3264_v48 }
 0x967   :  { %2384 = vpow2.f32 %v1935_v58  ;;  %v3289_v31 = vpop.f32.mrb[46].mxu1  ;;  %v1614_v33 = vadd.f32 %v1613_v30, %v3264_v48  ;;  %v1540_v34 = vpop.f32.mrb[55].mxu0 }
 0x968   :  { %2386 = vpow2.f32 %v1934_v56  ;;  %v1616_v35 = vpop.f32.mrb[47].mxu1  ;;  %v1654_v37 = vand.u32 2147483647, %v3285_v32  ;;  %v3294_v36 = vadd.f32 %v1540_v34, %v3259_v45  ;;  %v1939_v15 = vmul.f32 -1.442695, %v1622_v14 }
 0x969   :  { %2388 = vpow2.f32 %v1670_v28  ;;  %v1937_v47 = vmul.f32 -1.442695, %v1614_v33  ;;  %v1617_v54 = vadd.f32 %v1616_v35, %v3264_v48  ;;  %v1629_v28 = vmax.f32 %v3277_v40, 0.0 }
 0x96a   :  { %2390 = vpow2.f32 %v1936_v5  ;;  %v1662_v60 = vsub.f32 0.0, %v1654_v37  ;;  %v1655_v61 = vand.u32 2147483647, %v3294_v36  ;;  %v1625_v5 = vadd.f32 %v3289_v31, %v3264_v48 }
 0x96b   :  { %2392 = vpow2.f32 %v1937_v47  ;;  %v1938_v23 = vmul.f32 -1.442695, %v1617_v54  ;;  %vm1638_vm9 = vcmp.ne.f32.partialorder %v3285_v32, %v3285_v32  ;;  %vm1639_vm10 = vcmp.ne.f32.partialorder %v3294_v36, %v3294_v36 }
 0x96c   :  { %v3297_v38 = vpop.f32.mrb[56].mxu0  ;;  %v1672_v10 = vmul.f32 1.442695, %v1662_v60  ;;  %v1663_v9 = vsub.f32 0.0, %v1655_v61 }
 0x96d   :  { %v1546_v44 = vpop.f32.mrb[57].mxu0  ;;  %v2381_v8 = vpop.eup %2380 }
 0x96e   :  { %v3300_v11 = vadd.f32 %v1546_v44, %v3259_v45  ;;  %v3302_v27 = vpop.f32.mrb[58].mxu0  ;;  %v1674_v51 = vmul.f32 1.442695, %v1663_v9  ;;  %v1796_v24 = vadd.f32 1.0, %v2381_v8  ;;  %2394 = vpow2.f32 %v1672_v10 }
 0x96f   :  { %v1550_v13 = vpop.f32.mrb[59].mxu0  ;;  %v1940_v9 = vmul.f32 -1.442695, %v1625_v5 }
 0x970   :  { %v3304_v17 = vpop.eup %2382  ;;  %2396 = vpow2.f32 %v1674_v51  ;;  %v1656_v16 = vand.u32 2147483647, %v3300_v11  ;;  %v3318_v43 = vadd.f32 %v1550_v13, %v3259_v45  ;;  %vm1640_vm12 = vcmp.ne.f32.partialorder %v3300_v11, %v3300_v11 }
 0x971   :  { %v2385_v18 = vpop.eup %2384  ;;  %v1684_v20 = vadd.f32 1.0, %v3304_v17  ;;  %v1687_v62 = vmul.f32 -0.5, %v3304_v17  ;;  %v1690_v30 = vand.u32 2147483647, %v3304_v17 }
 0x972   :  { %v2387_v0 = vpop.eup %2386  ;;  %v1664_v39 = vsub.f32 0.0, %v1656_v16  ;;  %v1798_v2 = vadd.f32 1.0, %v2385_v18  ;;  %v1657_v53 = vand.u32 2147483647, %v3318_v43  ;;  %v2465_v16 = vld [vmem:[%s3483_s0] sm:$0xff]  ;;  %vm1641_vm14 = vcmp.ne.f32.partialorder %v3318_v43, %v3318_v43 }
 0x973   :  { %v3309_v12 = vpop.eup %2388  ;;  %2398 = vlog2.f32 %v1684_v20  ;;  %v1797_v46 = vadd.f32 1.0, %v2387_v0  ;;  %v1688_v21 = vadd.f32 1.0, %v1687_v62  ;;  %vm1691_vm4 = vcmp.lt.f32.partialorder %v1690_v30, 0.0004427343 }
 0x974   :  { %v1693_v4 = vadd.f32 1.0, %v3309_v12  ;;  %v3320_v3 = vpop.f32.mrb[60].mxu0  ;;  %v2391_v1 = vpop.eup %2390  ;;  %2400 = vrcp.f32 %v1796_v24  ;;  %v1676_v59 = vmul.f32 1.442695, %v1664_v39  ;;  %v1696_v55 = vmul.f32 -0.5, %v3309_v12 }
 0x975   :  { %v1556_v42 = vpop.f32.mrb[61].mxu0  ;;  %v1799_v58 = vadd.f32 1.0, %v2391_v1  ;;  %v2393_v25 = vpop.eup %2392  ;;  %v1665_v57 = vsub.f32 0.0, %v1657_v53  ;;  %v1699_v47 = vand.u32 2147483647, %v3309_v12  ;;  %v1689_v48 = vmul.f32 %v3304_v17, %v1688_v21 }
 0x976   :  { %2402 = vlog2.f32 %v1693_v4  ;;  %v3324_v19 = vpop.f32.mrb[62].mxu0  ;;  %v3334_v56 = vadd.f32 %v1556_v42, %v3259_v45  ;;  %v1697_v34 = vadd.f32 1.0, %v1696_v55  ;;  %v1800_v20 = vadd.f32 1.0, %v2393_v25 }
 0x977   :  { %v1560_v22 = vpop.f32.mrb[63].mxu0  ;;  %2404 = vrcp.f32 %v1797_v46  ;;  %v1678_v37 = vmul.f32 1.442695, %v1665_v57  ;;  %vm1700_vm6 = vcmp.lt.f32.partialorder %v1699_v47, 0.0004427343 }
 0x978   :  { %2406 = vpow2.f32 %v1939_v15  ;;  %v3338_v41 = vpop.eup %2394  ;;  %v1658_v10 = vand.u32 2147483647, %v3334_v56  ;;  %v3352_v31 = vadd.f32 %v1560_v22, %v3259_v45  ;;  %v1698_v18 = vmul.f32 %v3309_v12, %v1697_v34  ;;  %v2466_v22 = vld [vmem:[%s3483_s0 + $0x8] sm:$0xff] }
 0x979   :  { %2408 = vrcp.f32 %v1798_v2  ;;  %v1702_v35 = vadd.f32 1.0, %v3338_v41  ;;  %v1705_v17 = vmul.f32 -0.5, %v3338_v41  ;;  %v1708_v53 = vand.u32 2147483647, %v3338_v41 }
 0x97a   :  { %2410 = vpow2.f32 %v1676_v59  ;;  %v3344_v33 = vpop.eup %2396  ;;  %v1666_v0 = vsub.f32 0.0, %v1658_v10  ;;  %v1659_v46 = vand.u32 2147483647, %v3352_v31  ;;  %vm1642_vm1 = vcmp.ne.f32.partialorder %v3334_v56, %v3334_v56 }
 0x97b   :  { %2412 = vrcp.f32 %v1799_v58  ;;  %v1711_v61 = vadd.f32 1.0, %v3344_v33  ;;  %v1714_v4 = vmul.f32 -0.5, %v3344_v33  ;;  %v1706_v58 = vadd.f32 1.0, %v1705_v17 }
 0x97c   :  { %2414 = vpow2.f32 %v1938_v23  ;;  %v1680_v54 = vmul.f32 1.442695, %v1666_v0  ;;  %v1667_v2 = vsub.f32 0.0, %v1659_v46  ;;  %vm1709_vm7 = vcmp.lt.f32.partialorder %v1708_v53, 0.0004427343 }
 0x97d   :  { %v2399_v60 = vpop.eup %2398  ;;  %2416 = vlog2.f32 %v1702_v35  ;;  %v1715_v21 = vadd.f32 1.0, %v1714_v4  ;;  %v1535_v17 = vadd.f32 %v3282_v26, %v3314_v6 }
 0x97e   :  { %v1686_v44 = vmul.f32 0.6931472, %v2399_v60  ;;  %v2401_v8 = vpop.eup %2400  ;;  %2418 = vlog2.f32 %v1711_v61  ;;  %v1682_v34 = vmul.f32 1.442695, %v1667_v2  ;;  %v1707_v61 = vmul.f32 %v3338_v41, %v1706_v58 }
 0x97f   :  { %2420 = vpow2.f32 %v1678_v37  ;;  %v1820_v7 = vmul.f32 %v2465_v16, %v2401_v8 }
 0x980   :  { %v2403_v13 = vpop.eup %2402  ;;  %v1692_v51 = vsel %vm1691_vm4, %v1689_v48, %v1686_v44  ;;  %2422 = vpow2.f32 %v1940_v9  ;;  %v1716_v44 = vmul.f32 %v3344_v33, %v1715_v21 }
 0x981   :  { %v1756_v24 = vadd.f32 %v1692_v51, %v1628_v63  ;;  %v1695_v14 = vmul.f32 0.6931472, %v2403_v13  ;;  %v2405_v45 = vpop.eup %2404  ;;  %2424 = vrcp.f32 %v1800_v20 }
 0x982   :  { %v3363_v1 = vpop.eup %2406  ;;  %v1821_v55 = vmul.f32 %v2466_v22, %v2405_v45  ;;  %2426 = vpow2.f32 %v1680_v54  ;;  %v2468_v45 = vld [vmem:[%s3483_s0 + $0x18] sm:$0xff] }
 0x983   :  { %v1764_v12 = vsel %vm1636_vm2, %v3269_v49, %v1756_v24  ;;  %v1701_v15 = vsel %vm1700_vm6, %v1698_v18, %v1695_v14  ;;  %v2409_v39 = vpop.eup %2408  ;;  %v1717_v49 = vand.u32 2147483647, %v3344_v33  ;;  %v2467_v33 = vld [vmem:[%s3483_s0 + $0x10] sm:$0xff]  ;;  %vm1643_vm2 = vcmp.ne.f32.partialorder %v3352_v31, %v3352_v31 }
 0x984   :  { %v1828_v42 = vmul.f32 %v1820_v7, %v1764_v12  ;;  %v1757_v62 = vadd.f32 %v1701_v15, %v1629_v28  ;;  %v3369_v59 = vpop.eup %2410  ;;  %v1529_v28 = vadd.f32 %v3271_v50, %v3314_v6  ;;  %v1822_v20 = vmul.f32 %v2467_v33, %v2409_v39 }
 0x985   :  { %v2413_v63 = vpop.eup %2412  ;;  %v1720_v57 = vadd.f32 1.0, %v3369_v59  ;;  %vm1718_vm8 = vcmp.lt.f32.partialorder %v1717_v49, 0.0004427343  ;;  %v1723_v9 = vmul.f32 -0.5, %v3369_v59  ;;  %v1539_v12 = vadd.f32 %v3287_v29, %v3314_v6 }
 0x986   :  { %v1836_v23 = vadd.f32 %v1828_v42, %v3328_v52  ;;  %v1765_v25 = vsel %vm1637_vm5, %v3277_v40, %v1757_v62  ;;  %v2415_v30 = vpop.eup %2414  ;;  %v1630_v52 = vmax.f32 %v3285_v32, 0.0  ;;  %v1631_v40 = vmax.f32 %v3294_v36, 0.0 }
 0x987   :  { %v1829_v5 = vmul.f32 %v1821_v55, %v1765_v25  ;;  %v2417_v35 = vpop.eup %2416  ;;  %2428 = vlog2.f32 %v1720_v57  ;;  %v1801_v8 = vadd.f32 1.0, %v2415_v30  ;;  %v1823_v16 = vmul.f32 %v2468_v45, %v2413_v63 }
 0x988   :  { %1845 = vst.msk [vmem:[%s3485_s3] sm:$0xff] %vm1844_vm3, %v1836_v23  ;;  %v2419_v37 = vpop.eup %2418  ;;  %v1704_v47 = vmul.f32 0.6931472, %v2417_v35  ;;  %2430 = vpow2.f32 %v1682_v34  ;;  %v1724_v46 = vadd.f32 1.0, %v1723_v9  ;;  %v1726_v26 = vand.u32 2147483647, %v3369_v59 }
 0x989   :  { %v1837_v60 = vadd.f32 %v1829_v5, %v1529_v28  ;;  %v3391_v50 = vpop.eup %2420  ;;  %v1713_v10 = vmul.f32 0.6931472, %v2419_v37  ;;  %v1802_v42 = vadd.f32 1.0, %v3363_v1  ;;  %v1632_v29 = vmax.f32 %v3300_v11, 0.0 }
 0x98a   :  { %v1710_v48 = vsel %vm1709_vm7, %v1707_v61, %v1704_v47  ;;  %v1729_v13 = vadd.f32 1.0, %v3391_v50  ;;  %v2423_v18 = vpop.eup %2422  ;;  %v1725_v53 = vmul.f32 %v3369_v59, %v1724_v46  ;;  %vm1727_vm11 = vcmp.lt.f32.partialorder %v1726_v26, 0.0004427343  ;;  %v2469_v59 = vld [vmem:[%s3483_s0 + $0x20] sm:$0xff] }
 0x98b   :  { %1846 = vst.msk [vmem:[%s3485_s3 + $0x8] sm:$0xff] %vm1844_vm3, %v1837_v60  ;;  %v1758_v41 = vadd.f32 %v1710_v48, %v1630_v52  ;;  %v1719_v51 = vsel %vm1718_vm8, %v1716_v44, %v1713_v10  ;;  %v2425_v14 = vpop.eup %2424  ;;  %v1735_v23 = vand.u32 2147483647, %v3391_v50  ;;  %v1545_v57 = vadd.f32 %v3297_v38, %v3314_v6 }
 0x98c   :  { %v1759_v24 = vadd.f32 %v1719_v51, %v1631_v40  ;;  %2432 = vlog2.f32 %v1729_v13  ;;  %v2427_v54 = vpop.eup %2426  ;;  %v1824_v30 = vmul.f32 %v2469_v59, %v2425_v14  ;;  %v1633_v37 = vmax.f32 %v3318_v43, 0.0 }
 0x98d   :  { %v1766_v0 = vsel %vm1638_vm9, %v3285_v32, %v1758_v41  ;;  %2434 = vrcp.f32 %v1801_v8  ;;  %v1732_v32 = vmul.f32 -0.5, %v3391_v50  ;;  %v1738_v22 = vadd.f32 1.0, %v2427_v54 }
 0x98e   :  { %v1830_v7 = vmul.f32 %v1822_v20, %v1766_v0  ;;  %v1767_v4 = vsel %vm1639_vm10, %v3294_v36, %v1759_v24  ;;  %v1803_v36 = vadd.f32 1.0, %v2423_v18  ;;  %v1741_v28 = vmul.f32 -0.5, %v2427_v54 }
 0x98f   :  { %v1831_v15 = vmul.f32 %v1823_v16, %v1767_v4  ;;  %v1733_v1 = vadd.f32 1.0, %v1732_v32  ;;  %2436 = vlog2.f32 %v1738_v22  ;;  %vm1736_vm13 = vcmp.lt.f32.partialorder %v1735_v23, 0.0004427343  ;;  %v2471_v4 = vld [vmem:[%s3483_s0 + $0x30] sm:$0xff] }
 0x990   :  { %v1838_v39 = vadd.f32 %v1830_v7, %v1535_v17  ;;  %2438 = vrcp.f32 %v1802_v42  ;;  %v1742_v10 = vadd.f32 1.0, %v1741_v28  ;;  %v1744_v48 = vand.u32 2147483647, %v2427_v54 }
 0x991   :  { %v2429_v62 = vpop.eup %2428  ;;  %v1839_v2 = vadd.f32 %v1831_v15, %v1539_v12  ;;  %v1734_v35 = vmul.f32 %v3391_v50, %v1733_v1  ;;  %v1549_v13 = vadd.f32 %v3302_v27, %v3314_v6  ;;  %v1634_v17 = vmax.f32 %v3334_v56, 0.0 }
 0x992   :  { %v2431_v55 = vpop.eup %2430  ;;  %1847 = vst.msk [vmem:[%s3485_s3 + $0x10] sm:$0xff] %vm1844_vm3, %v1838_v39  ;;  %v1722_v58 = vmul.f32 0.6931472, %v2429_v62  ;;  %v1743_v20 = vmul.f32 %v2427_v54, %v1742_v10  ;;  %vm1745_vm15 = vcmp.lt.f32.partialorder %v1744_v48, 0.0004427343  ;;  %v1555_v32 = vadd.f32 %v3320_v3, %v3314_v6  ;;  %v2472_v39 = vld [vmem:[%s3483_s0 + $0x38] sm:$0xff] }
 0x993   :  { %1848 = vst.msk [vmem:[%s3485_s3 + $0x18] sm:$0xff] %vm1844_vm3, %v1839_v2  ;;  %v1747_v49 = vadd.f32 1.0, %v2431_v55  ;;  %v1750_v38 = vmul.f32 -0.5, %v2431_v55  ;;  %v1753_v51 = vand.u32 2147483647, %v2431_v55  ;;  %v1559_v22 = vadd.f32 %v3324_v19, %v3314_v6 }
 0x994   :  { %v1728_v63 = vsel %vm1727_vm11, %v1725_v53, %v1722_v58 }
 0x995   :  { %v1760_v25 = vadd.f32 %v1728_v63, %v1632_v29  ;;  %2440 = vlog2.f32 %v1747_v49  ;;  %v1751_v8 = vadd.f32 1.0, %v1750_v38  ;;  %vm1754_vm0 = vcmp.lt.f32.partialorder %v1753_v51, 0.0004427343 }
 0x996   :  { %v2433_v21 = vpop.eup %2432  ;;  %2442 = vrcp.f32 %v1803_v36 }
 0x997   :  { %v1768_v5 = vsel %vm1640_vm12, %v3300_v11, %v1760_v25  ;;  %v1731_v34 = vmul.f32 0.6931472, %v2433_v21  ;;  %v2435_v52 = vpop.eup %2434  ;;  %v2470_v11 = vld [vmem:[%s3483_s0 + $0x28] sm:$0xff]  ;;  %v1752_v16 = vmul.f32 %v2431_v55, %v1751_v8 }
 0x998   :  { %v1832_v40 = vmul.f32 %v1824_v30, %v1768_v5  ;;  %v1825_v44 = vmul.f32 %v2470_v11, %v2435_v52 }
 0x999   :  { %v1737_v60 = vsel %vm1736_vm13, %v1734_v35, %v1731_v34  ;;  %v2437_v9 = vpop.eup %2436 }
 0x99a   :  { %v1840_v47 = vadd.f32 %v1832_v40, %v1545_v57  ;;  %v1761_v61 = vadd.f32 %v1737_v60, %v1633_v37  ;;  %v2439_v18 = vpop.eup %2438  ;;  %v1740_v33 = vmul.f32 0.6931472, %v2437_v9 }
 0x99b   :  { %v1826_v46 = vmul.f32 %v2471_v4, %v2439_v18 }
 0x99c   :  { %1849 = vst.msk [vmem:[%s3485_s3 + $0x20] sm:$0xff] %vm1844_vm3, %v1840_v47  ;;  %v1769_v50 = vsel %vm1641_vm14, %v3318_v43, %v1761_v61  ;;  %v1746_v0 = vsel %vm1745_vm15, %v1743_v20, %v1740_v33  ;;  %v1635_v43 = vmax.f32 %v3352_v31, 0.0 }
 0x99d   :  { %v1833_v41 = vmul.f32 %v1825_v44, %v1769_v50  ;;  %v1762_v27 = vadd.f32 %v1746_v0, %v1634_v17 }
 0x99f   :  { %v2441_v24 = vpop.eup %2440  ;;  %v1841_v14 = vadd.f32 %v1833_v41, %v1549_v13  ;;  %v1770_v15 = vsel %vm1642_vm1, %v3334_v56, %v1762_v27 }
 0x9a0   :  { %v1749_v45 = vmul.f32 0.6931472, %v2441_v24  ;;  %v2443_v7 = vpop.eup %2442  ;;  %v1834_v54 = vmul.f32 %v1826_v46, %v1770_v15 }
 0x9a1   :  { %1850 = vst.msk [vmem:[%s3485_s3 + $0x28] sm:$0xff] %vm1844_vm3, %v1841_v14  ;;  %v1827_v42 = vmul.f32 %v2472_v39, %v2443_v7 }
 0x9a2   :  { %v1755_v12 = vsel %vm1754_vm0, %v1752_v16, %v1749_v45  ;;  %v1842_v2 = vadd.f32 %v1834_v54, %v1555_v32 }
 0x9a3   :  { %v1763_v26 = vadd.f32 %v1755_v12, %v1635_v43 }
 0x9a4   :  { %1851 = vst.msk [vmem:[%s3485_s3 + $0x30] sm:$0xff] %vm1844_vm3, %v1842_v2 }
 0x9a5   :  { %v1771_v62 = vsel %vm1643_vm2, %v3352_v31, %v1763_v26 }
 0x9a6   :  { %v1835_v56 = vmul.f32 %v1827_v42, %v1771_v62 }
 0x9a8   :  { %v1843_v3 = vadd.f32 %v1835_v56, %v1559_v22 }
 0x9aa   :  { %1852 = vst.msk [vmem:[%s3485_s3 + $0x38] sm:$0xff] %vm1844_vm3, %v1843_v3 }

</bundles_post_ra>
